<compile_context>
chip_gen: v5e
topology: v5e:2x2
jax: 0.10.0
libtpu: 0.0.40
codegen_flags: <defaults>
</compile_context>

<pallas_src>
import functools
import math

import jax
import jax.numpy as jnp
from jax.experimental import pallas as pl
from jax.experimental.pallas import tpu as pltpu

# Small-but-consistent hyper-parameters (module defaults scaled down):
N_UNITS = 32          # transformer width  (PyTorch default: 256)
NUM_ANCHORS = 2
N_LAYERS = 2
E_UNITS = 64          # FFN hidden size    (PyTorch default: 512)
N_HEADS = 4
LN_EPS = 1e-5

_VMEM = pl.BlockSpec(memory_space=pltpu.MemorySpace.VMEM)


def _layernorm(x, g, b, eps):
    mean = jnp.mean(x, axis=-1, keepdims=True)
    var = jnp.mean(jnp.square(x - mean), axis=-1, keepdims=True)
    return (x - mean) * jax.lax.rsqrt(var + eps) * g + b


# ----------------------------- Fused Pallas kernel --------------------------

def _fused_out_layer_kernel(
        # inputs ------------------------------------------------------------
        x_ref,                       # (bs*T, num*dim)
        w_in_ref, b_in_ref,          # (num*dim, n_units), (1, n_units)
        ln1_g_ref, ln1_b_ref,        # (L, 1, n_units) each
        wqkv_ref, bqkv_ref,          # (L, n_units, 3n), (L, 1, 3n)  fused Q|K|V
        wo_ref, bo_ref,              # (L, n_units, n_units), (L, 1, n_units)
        ln2_g_ref, ln2_b_ref,        # (L, 1, n_units) each
        ff1_w_ref, ff1_b_ref,        # (L, n_units, e_units), (L, 1, e_units)
        ff2_w_ref, ff2_b_ref,        # (L, e_units, n_units), (L, 1, n_units)
        lno_g_ref, lno_b_ref,        # (1, n_units) each
        w_out_ref, b_out_ref,        # (n_units, num) block-diag, (1, num)
        # output ------------------------------------------------------------
        o_ref,                       # (bs*T, num)
        # scratch -----------------------------------------------------------
        qkv_scr,                     # VMEM (bs*T, 3*n_units) f32
        *, bs, T, n_units, n_heads, n_layers, eps):
    d_k = n_units // n_heads

    x = x_ref[...].astype(jnp.float32)
    e = jnp.dot(x, w_in_ref[...], preferred_element_type=jnp.float32) + b_in_ref[...]

    for i in range(n_layers):
        # Pre-attention LayerNorm (residual is taken off the normed act,
        # exactly as in the reference forward; dropout is identity).
        e = _layernorm(e, ln1_g_ref[i], ln1_b_ref[i], eps)

        # Fused Q|K|V projection: one lane-dense matmul instead of three.
        # NOTE: 1/sqrt(d_k) is already folded into the Q weights/bias.
        qkv_scr[...] = (jnp.dot(e, wqkv_ref[i], preferred_element_type=jnp.float32)
                        + bqkv_ref[i])

        # Scaled dot-product attention per (batch, head).  In the PyTorch
        # head-split, head hh == lane slice [hh*d_k, (hh+1)*d_k) and batch b
        # == row slice [b*T, (b+1)*T) — so no transposes are needed at all.
        # Per-head contexts are kept in vregs and concatenated back into the
        # (bs*T, n_units) layout expected by linearO.
        batch_ctx = []
        for b in range(bs):
            rows = pl.ds(b * T, T)
            head_ctx = []
            for hh in range(n_heads):
                q_bh = qkv_scr[rows, pl.ds(hh * d_k, d_k)]
                k_bh = qkv_scr[rows, pl.ds(n_units + hh * d_k, d_k)]
                v_bh = qkv_scr[rows, pl.ds(2 * n_units + hh * d_k, d_k)]
                s = jax.lax.dot_general(
                    q_bh, k_bh, (((1,), (1,)), ((), ())),
                    preferred_element_type=jnp.float32)
                s = s - jnp.max(s, axis=-1, keepdims=True)
                p = jnp.exp(s)
                p = p * pl.reciprocal(jnp.sum(p, axis=-1, keepdims=True),
                                      approx=True)
                head_ctx.append(jnp.dot(p, v_bh,
                                        preferred_element_type=jnp.float32))
            batch_ctx.append(jnp.concatenate(head_ctx, axis=-1))   # (T, n_units)
        ctx = jnp.concatenate(batch_ctx, axis=0)                   # (bs*T, n_units)

        s_att = (jnp.dot(ctx, wo_ref[i],
                         preferred_element_type=jnp.float32) + bo_ref[i])
        e = e + s_att

        # Position-wise FFN.
        e = _layernorm(e, ln2_g_ref[i], ln2_b_ref[i], eps)
        f = jnp.dot(e, ff1_w_ref[i], preferred_element_type=jnp.float32) + ff1_b_ref[i]
        f = jnp.maximum(f, 0.0)
        f = jnp.dot(f, ff2_w_ref[i], preferred_element_type=jnp.float32) + ff2_b_ref[i]
        e = e + f

    # Output LayerNorm + block-diagonal per-anchor projection (lane-dense,
    # fused into the same kernel instead of a separate width-1 pallas_call).
    e = _layernorm(e, lno_g_ref[...], lno_b_ref[...], eps)
    o_ref[...] = (jnp.dot(e, w_out_ref[...], preferred_element_type=jnp.float32)
                  + b_out_ref[...]).astype(o_ref.dtype)


# ------------------------------- Param packing -------------------------------

def _pack_params(params, num_anchors, n_heads):
    """Stack per-layer weights, fuse Q|K|V (with the attention scale folded
    into Q), and build the block-diagonal per-anchor output projection."""
    layers = params["layers"]
    n_units = params["linear_in_w"].shape[1]
    scale = 1.0 / math.sqrt(n_units // n_heads)

    def stack(name, row=False):
        arrs = [lp[name] for lp in layers]
        if row:
            arrs = [a[None, :] for a in arrs]
        return jnp.stack(arrs)

    wqkv = jnp.stack(
        [jnp.concatenate([lp["wq"] * scale, lp["wk"], lp["wv"]], axis=1)
         for lp in layers])
    bqkv = jnp.stack(
        [jnp.concatenate([lp["bq"] * scale, lp["bk"], lp["bv"]])[None, :]
         for lp in layers])

    # out_linear (sub -> 1) applied per anchor  ==  block-diag (n_units, num).
    w_out_bd = jnp.kron(jnp.eye(num_anchors, dtype=params["out_w"].dtype),
                        params["out_w"])
    b_out = jnp.broadcast_to(params["out_b"], (num_anchors,))[None, :]

    return dict(
        w_in=params["linear_in_w"], b_in=params["linear_in_b"][None, :],
        ln1_g=stack("ln1_g", True), ln1_b=stack("ln1_b", True),
        wqkv=wqkv, bqkv=bqkv,
        wo=stack("wo"), bo=stack("bo", True),
        ln2_g=stack("ln2_g", True), ln2_b=stack("ln2_b", True),
        ff1_w=stack("ff1_w"), ff1_b=stack("ff1_b", True),
        ff2_w=stack("ff2_w"), ff2_b=stack("ff2_b", True),
        lno_g=params["ln_out_g"][None, :], lno_b=params["ln_out_b"][None, :],
        w_out_bd=w_out_bd, b_out=b_out,
    )


# ------------------------------- Forward pass --------------------------------

def out_layer_forward(x, params):
    bs, num, T, dim = x.shape
    n_units = params["linear_in_w"].shape[1]
    n_layers = len(params["layers"])
    M = bs * T

    # OutLayer: anchors next to features, flatten (one-time layout glue).
    xo = jnp.transpose(x, (0, 2, 1, 3)).reshape(M, num * dim)

    p = _pack_params(params, num, N_HEADS)
    kernel = functools.partial(
        _fused_out_layer_kernel, bs=bs, T=T, n_units=n_units,
        n_heads=N_HEADS, n_layers=n_layers, eps=LN_EPS)

    out = pl.pallas_call(
        kernel,
        out_shape=jax.ShapeDtypeStruct((M, num), jnp.float32),
        in_specs=[_VMEM] * 19,
        out_specs=_VMEM,
        scratch_shapes=[pltpu.VMEM((M, 3 * n_units), jnp.float32)],
    )(xo,
      p["w_in"], p["b_in"],
      p["ln1_g"], p["ln1_b"], p["wqkv"], p["bqkv"], p["wo"], p["bo"],
      p["ln2_g"], p["ln2_b"], p["ff1_w"], p["ff1_b"], p["ff2_w"], p["ff2_b"],
      p["lno_g"], p["lno_b"], p["w_out_bd"], p["b_out"])
    return out.reshape(bs, T, num)


# --------------------------- Pure-JAX reference -------------------------------

def out_layer_forward_ref(x, params):
    bs, num, T, dim = x.shape
    n_units = params["linear_in_w"].shape[1]
    h = N_HEADS
    d_k = n_units // h
    xo = jnp.transpose(x, (0, 2, 1, 3)).reshape(bs * T, num * dim)
    e = xo @ params["linear_in_w"] + params["linear_in_b"]
    for lp in params["layers"]:
        e = _layernorm(e, lp["ln1_g"], lp["ln1_b"], LN_EPS)
        q = (e @ lp["wq"] + lp["bq"]).reshape(bs, T, h, d_k).transpose(0, 2, 1, 3)
        k = (e @ lp["wk"] + lp["bk"]).reshape(bs, T, h, d_k).transpose(0, 2, 1, 3)
        v = (e @ lp["wv"] + lp["bv"]).reshape(bs, T, h, d_k).transpose(0, 2, 1, 3)
        s = jnp.einsum("bhqd,bhkd->bhqk", q, k) / math.sqrt(d_k)
        a = jax.nn.softmax(s, axis=-1)
        ctx = jnp.einsum("bhqk,bhkd->bhqd", a, v)
        ctx = ctx.transpose(0, 2, 1, 3).reshape(bs * T, n_units)
        e = e + (ctx @ lp["wo"] + lp["bo"])
        e = _layernorm(e, lp["ln2_g"], lp["ln2_b"], LN_EPS)
        f = jnp.maximum(e @ lp["ff1_w"] + lp["ff1_b"], 0.0)
        e = e + (f @ lp["ff2_w"] + lp["ff2_b"])
    e = _layernorm(e, params["ln_out_g"], params["ln_out_b"], LN_EPS)
    o = e.reshape(bs * T * num, n_units // num) @ params["out_w"] + params["out_b"]
    return o.reshape(bs, T, num)


# --------------------------- Deterministic params ----------------------------

def init_params(key):
    idim = NUM_ANCHORS * N_UNITS
    keys = jax.random.split(key, 128)
    counter = iter(range(128))

    def lin(din, dout, scale=0.05):
        w = jax.random.normal(keys[next(counter)], (din, dout), jnp.float32) * scale
        b = jax.random.normal(keys[next(counter)], (dout,), jnp.float32) * scale
        return w, b

    params = {}
    params["linear_in_w"], params["linear_in_b"] = lin(idim, N_UNITS)
    layers = []
    for _ in range(N_LAYERS):
        lp = {}
        lp["ln1_g"] = jnp.ones((N_UNITS,), jnp.float32)
        lp["ln1_b"] = jnp.zeros((N_UNITS,), jnp.float32)
        lp["wq"], lp["bq"] = lin(N_UNITS, N_UNITS)
        lp["wk"], lp["bk"] = lin(N_UNITS, N_UNITS)
        lp["wv"], lp["bv"] = lin(N_UNITS, N_UNITS)
        lp["wo"], lp["bo"] = lin(N_UNITS, N_UNITS)
        lp["ln2_g"] = jnp.ones((N_UNITS,), jnp.float32)
        lp["ln2_b"] = jnp.zeros((N_UNITS,), jnp.float32)
        lp["ff1_w"], lp["ff1_b"] = lin(N_UNITS, E_UNITS)
        lp["ff2_w"], lp["ff2_b"] = lin(E_UNITS, N_UNITS)
        layers.append(lp)
    params["layers"] = layers
    params["ln_out_g"] = jnp.ones((N_UNITS,), jnp.float32)
    params["ln_out_b"] = jnp.zeros((N_UNITS,), jnp.float32)
    params["out_w"], params["out_b"] = lin(N_UNITS // NUM_ANCHORS, 1)
    return params


if __name__ == "__main__":
    bs, tframe = 2, 8
    kx, kp = jax.random.split(jax.random.PRNGKey(0))
    x = jax.random.normal(kx, (bs, NUM_ANCHORS, tframe, N_UNITS), jnp.float32)
    params = init_params(kp)

    fwd = jax.jit(out_layer_forward)
    out = fwd(x, params)
    jax.block_until_ready(out)

    # pure-JAX reference (exact-divide softmax); approx-reciprocal softmax in
    # the kernel => slightly looser tolerance than 1e-4.
    ref = out_layer_forward_ref(x, params)
    assert out.shape == (bs, tframe, NUM_ANCHORS), out.shape
    assert jnp.allclose(out, ref, rtol=1e-3, atol=2e-3), (
        "mismatch vs JAX reference, max abs err = "
        + str(float(jnp.max(jnp.abs(out - ref)))))

    print("KERNEL_OK")
</pallas_src>

<mosaic_0001>
module attributes {stable_mosaic.version = 11 : i64} {
  func.func @_fused_out_layer_kernel(%arg0: memref<16x64xf32, #tpu.memory_space<vmem>>, %arg1: memref<64x32xf32, #tpu.memory_space<vmem>>, %arg2: memref<1x32xf32, #tpu.memory_space<vmem>>, %arg3: memref<2x1x32xf32, #tpu.memory_space<vmem>>, %arg4: memref<2x1x32xf32, #tpu.memory_space<vmem>>, %arg5: memref<2x32x96xf32, #tpu.memory_space<vmem>>, %arg6: memref<2x1x96xf32, #tpu.memory_space<vmem>>, %arg7: memref<2x32x32xf32, #tpu.memory_space<vmem>>, %arg8: memref<2x1x32xf32, #tpu.memory_space<vmem>>, %arg9: memref<2x1x32xf32, #tpu.memory_space<vmem>>, %arg10: memref<2x1x32xf32, #tpu.memory_space<vmem>>, %arg11: memref<2x32x64xf32, #tpu.memory_space<vmem>>, %arg12: memref<2x1x64xf32, #tpu.memory_space<vmem>>, %arg13: memref<2x64x32xf32, #tpu.memory_space<vmem>>, %arg14: memref<2x1x32xf32, #tpu.memory_space<vmem>>, %arg15: memref<1x32xf32, #tpu.memory_space<vmem>>, %arg16: memref<1x32xf32, #tpu.memory_space<vmem>>, %arg17: memref<32x2xf32, #tpu.memory_space<vmem>>, %arg18: memref<1x2xf32, #tpu.memory_space<vmem>>, %arg19: memref<16x2xf32, #tpu.memory_space<vmem>>, %arg20: memref<16x96xf32, #tpu.memory_space<vmem>>) attributes {dimension_semantics = [], scalar_prefetch = 0 : i64, scratch_operands = 1 : i64, tpu.core_type = #tpu.core_type<tc>} {
    %c0 = arith.constant 0 : index
    %c0_0 = arith.constant 0 : index
    %0 = vector.load %arg0[%c0, %c0_0] : memref<16x64xf32, #tpu.memory_space<vmem>>, vector<16x64xf32>
    %c0_1 = arith.constant 0 : index
    %c0_2 = arith.constant 0 : index
    %1 = vector.load %arg1[%c0_1, %c0_2] : memref<64x32xf32, #tpu.memory_space<vmem>>, vector<64x32xf32>
    %cst = arith.constant dense<0.000000e+00> : vector<16x32xf32>
    %2 = tpu.matmul %0, %1, %cst {dimension_numbers = #tpu.dot_dimension_numbers<[1], [0], [0], [1], [0, 0, 1, 1], [], []>} : vector<16x64xf32>, vector<64x32xf32>, vector<16x32xf32> -> vector<16x32xf32>
    %c0_3 = arith.constant 0 : index
    %c0_4 = arith.constant 0 : index
    %3 = vector.load %arg2[%c0_3, %c0_4] : memref<1x32xf32, #tpu.memory_space<vmem>>, vector<1x32xf32>
    %4 = vector.broadcast %3 : vector<1x32xf32> to vector<16x32xf32>
    %5 = arith.addf %2, %4 : vector<16x32xf32>
    %c0_5 = arith.constant 0 : index
    %c0_6 = arith.constant 0 : index
    %c0_7 = arith.constant 0 : index
    %6 = vector.load %arg3[%c0_5, %c0_6, %c0_7] : memref<2x1x32xf32, #tpu.memory_space<vmem>>, vector<1x1x32xf32>
    %7 = vector.shape_cast %6 : vector<1x1x32xf32> to vector<1x32xf32>
    %c0_8 = arith.constant 0 : index
    %c0_9 = arith.constant 0 : index
    %c0_10 = arith.constant 0 : index
    %8 = vector.load %arg4[%c0_8, %c0_9, %c0_10] : memref<2x1x32xf32, #tpu.memory_space<vmem>>, vector<1x1x32xf32>
    %9 = vector.shape_cast %8 : vector<1x1x32xf32> to vector<1x32xf32>
    %cst_11 = arith.constant dense<0.000000e+00> : vector<16xf32>
    %10 = vector.multi_reduction <add>, %5, %cst_11 [1] : vector<16x32xf32> to vector<16xf32>
    %11 = vector.shape_cast %10 : vector<16xf32> to vector<16x1xf32>
    %cst_12 = arith.constant 3.200000e+01 : f32
    %12 = vector.broadcast %cst_12 : f32 to vector<16x1xf32>
    %13 = arith.divf %11, %12 : vector<16x1xf32>
    %14 = vector.broadcast %13 : vector<16x1xf32> to vector<16x32xf32>
    %15 = arith.subf %5, %14 : vector<16x32xf32>
    %16 = arith.mulf %15, %15 : vector<16x32xf32>
    %cst_13 = arith.constant dense<0.000000e+00> : vector<16xf32>
    %17 = vector.multi_reduction <add>, %16, %cst_13 [1] : vector<16x32xf32> to vector<16xf32>
    %18 = vector.shape_cast %17 : vector<16xf32> to vector<16x1xf32>
    %cst_14 = arith.constant 3.200000e+01 : f32
    %19 = vector.broadcast %cst_14 : f32 to vector<16x1xf32>
    %20 = arith.divf %18, %19 : vector<16x1xf32>
    %21 = vector.broadcast %13 : vector<16x1xf32> to vector<16x32xf32>
    %22 = arith.subf %5, %21 : vector<16x32xf32>
    %cst_15 = arith.constant 9.99999974E-6 : f32
    %23 = vector.broadcast %cst_15 : f32 to vector<16x1xf32>
    %24 = arith.addf %20, %23 : vector<16x1xf32>
    %25 = math.rsqrt %24 : vector<16x1xf32>
    %26 = vector.broadcast %25 : vector<16x1xf32> to vector<16x32xf32>
    %27 = arith.mulf %22, %26 : vector<16x32xf32>
    %28 = vector.broadcast %7 : vector<1x32xf32> to vector<16x32xf32>
    %29 = arith.mulf %27, %28 : vector<16x32xf32>
    %30 = vector.broadcast %9 : vector<1x32xf32> to vector<16x32xf32>
    %31 = arith.addf %29, %30 : vector<16x32xf32>
    %c0_16 = arith.constant 0 : index
    %c0_17 = arith.constant 0 : index
    %c0_18 = arith.constant 0 : index
    %32 = vector.load %arg5[%c0_16, %c0_17, %c0_18] : memref<2x32x96xf32, #tpu.memory_space<vmem>>, vector<1x32x96xf32>
    %33 = vector.shape_cast %32 : vector<1x32x96xf32> to vector<32x96xf32>
    %cst_19 = arith.constant dense<0.000000e+00> : vector<16x96xf32>
    %34 = tpu.matmul %31, %33, %cst_19 {dimension_numbers = #tpu.dot_dimension_numbers<[1], [0], [0], [1], [0, 0, 1, 1], [], []>} : vector<16x32xf32>, vector<32x96xf32>, vector<16x96xf32> -> vector<16x96xf32>
    %c0_20 = arith.constant 0 : index
    %c0_21 = arith.constant 0 : index
    %c0_22 = arith.constant 0 : index
    %35 = vector.load %arg6[%c0_20, %c0_21, %c0_22] : memref<2x1x96xf32, #tpu.memory_space<vmem>>, vector<1x1x96xf32>
    %36 = vector.shape_cast %35 : vector<1x1x96xf32> to vector<1x96xf32>
    %37 = vector.broadcast %36 : vector<1x96xf32> to vector<16x96xf32>
    %38 = arith.addf %34, %37 : vector<16x96xf32>
    %c0_23 = arith.constant 0 : index
    %c0_24 = arith.constant 0 : index
    %39 = vector.load %arg20[%c0_23, %c0_24] : memref<16x96xf32, #tpu.memory_space<vmem>>, vector<16x96xf32>
    tpu.vector_store %arg20[%c0_23, %c0_24], %38 {strides = array<i32>} : memref<16x96xf32, #tpu.memory_space<vmem>>, vector<16x96xf32>,
    %c0_25 = arith.constant 0 : index
    %c0_26 = arith.constant 0 : index
    %40 = vector.load %arg20[%c0_25, %c0_26] : memref<16x96xf32, #tpu.memory_space<vmem>>, vector<8x8xf32>
    %c0_27 = arith.constant 0 : index
    %c32 = arith.constant 32 : index
    %41 = vector.load %arg20[%c0_27, %c32] : memref<16x96xf32, #tpu.memory_space<vmem>>, vector<8x8xf32>
    %c0_28 = arith.constant 0 : index
    %c64 = arith.constant 64 : index
    %42 = vector.load %arg20[%c0_28, %c64] : memref<16x96xf32, #tpu.memory_space<vmem>>, vector<8x8xf32>
    %cst_29 = arith.constant dense<0.000000e+00> : vector<8x8xf32>
    %43 = tpu.matmul %40, %41, %cst_29 {dimension_numbers = #tpu.dot_dimension_numbers<[1], [1], [0], [0], [0, 0, 1, 0], [], []>} : vector<8x8xf32>, vector<8x8xf32>, vector<8x8xf32> -> vector<8x8xf32>
    %cst_30 = arith.constant dense<0xFF800000> : vector<8xf32>
    %44 = vector.multi_reduction <maximumf>, %43, %cst_30 [1] : vector<8x8xf32> to vector<8xf32>
    %45 = vector.shape_cast %44 : vector<8xf32> to vector<8x1xf32>
    %46 = vector.broadcast %45 : vector<8x1xf32> to vector<8x8xf32>
    %47 = arith.subf %43, %46 : vector<8x8xf32>
    %48 = math.exp %47 : vector<8x8xf32>
    %cst_31 = arith.constant dense<0.000000e+00> : vector<8xf32>
    %49 = vector.multi_reduction <add>, %48, %cst_31 [1] : vector<8x8xf32> to vector<8xf32>
    %50 = vector.shape_cast %49 : vector<8xf32> to vector<8x1xf32>
    %51 = tpu.reciprocal %50 {approx = true} : vector<8x1xf32> -> vector<8x1xf32>
    %52 = vector.broadcast %51 : vector<8x1xf32> to vector<8x8xf32>
    %53 = arith.mulf %48, %52 : vector<8x8xf32>
    %cst_32 = arith.constant dense<0.000000e+00> : vector<8x8xf32>
    %54 = tpu.matmul %53, %42, %cst_32 {dimension_numbers = #tpu.dot_dimension_numbers<[1], [0], [0], [1], [0, 0, 1, 1], [], []>} : vector<8x8xf32>, vector<8x8xf32>, vector<8x8xf32> -> vector<8x8xf32>
    %c0_33 = arith.constant 0 : index
    %c8 = arith.constant 8 : index
    %55 = vector.load %arg20[%c0_33, %c8] : memref<16x96xf32, #tpu.memory_space<vmem>>, vector<8x8xf32>
    %c0_34 = arith.constant 0 : index
    %c40 = arith.constant 40 : index
    %56 = vector.load %arg20[%c0_34, %c40] : memref<16x96xf32, #tpu.memory_space<vmem>>, vector<8x8xf32>
    %c0_35 = arith.constant 0 : index
    %c72 = arith.constant 72 : index
    %57 = vector.load %arg20[%c0_35, %c72] : memref<16x96xf32, #tpu.memory_space<vmem>>, vector<8x8xf32>
    %cst_36 = arith.constant dense<0.000000e+00> : vector<8x8xf32>
    %58 = tpu.matmul %55, %56, %cst_36 {dimension_numbers = #tpu.dot_dimension_numbers<[1], [1], [0], [0], [0, 0, 1, 0], [], []>} : vector<8x8xf32>, vector<8x8xf32>, vector<8x8xf32> -> vector<8x8xf32>
    %cst_37 = arith.constant dense<0xFF800000> : vector<8xf32>
    %59 = vector.multi_reduction <maximumf>, %58, %cst_37 [1] : vector<8x8xf32> to vector<8xf32>
    %60 = vector.shape_cast %59 : vector<8xf32> to vector<8x1xf32>
    %61 = vector.broadcast %60 : vector<8x1xf32> to vector<8x8xf32>
    %62 = arith.subf %58, %61 : vector<8x8xf32>
    %63 = math.exp %62 : vector<8x8xf32>
    %cst_38 = arith.constant dense<0.000000e+00> : vector<8xf32>
    %64 = vector.multi_reduction <add>, %63, %cst_38 [1] : vector<8x8xf32> to vector<8xf32>
    %65 = vector.shape_cast %64 : vector<8xf32> to vector<8x1xf32>
    %66 = tpu.reciprocal %65 {approx = true} : vector<8x1xf32> -> vector<8x1xf32>
    %67 = vector.broadcast %66 : vector<8x1xf32> to vector<8x8xf32>
    %68 = arith.mulf %63, %67 : vector<8x8xf32>
    %cst_39 = arith.constant dense<0.000000e+00> : vector<8x8xf32>
    %69 = tpu.matmul %68, %57, %cst_39 {dimension_numbers = #tpu.dot_dimension_numbers<[1], [0], [0], [1], [0, 0, 1, 1], [], []>} : vector<8x8xf32>, vector<8x8xf32>, vector<8x8xf32> -> vector<8x8xf32>
    %c0_40 = arith.constant 0 : index
    %c16 = arith.constant 16 : index
    %70 = vector.load %arg20[%c0_40, %c16] : memref<16x96xf32, #tpu.memory_space<vmem>>, vector<8x8xf32>
    %c0_41 = arith.constant 0 : index
    %c48 = arith.constant 48 : index
    %71 = vector.load %arg20[%c0_41, %c48] : memref<16x96xf32, #tpu.memory_space<vmem>>, vector<8x8xf32>
    %c0_42 = arith.constant 0 : index
    %c80 = arith.constant 80 : index
    %72 = vector.load %arg20[%c0_42, %c80] : memref<16x96xf32, #tpu.memory_space<vmem>>, vector<8x8xf32>
    %cst_43 = arith.constant dense<0.000000e+00> : vector<8x8xf32>
    %73 = tpu.matmul %70, %71, %cst_43 {dimension_numbers = #tpu.dot_dimension_numbers<[1], [1], [0], [0], [0, 0, 1, 0], [], []>} : vector<8x8xf32>, vector<8x8xf32>, vector<8x8xf32> -> vector<8x8xf32>
    %cst_44 = arith.constant dense<0xFF800000> : vector<8xf32>
    %74 = vector.multi_reduction <maximumf>, %73, %cst_44 [1] : vector<8x8xf32> to vector<8xf32>
    %75 = vector.shape_cast %74 : vector<8xf32> to vector<8x1xf32>
    %76 = vector.broadcast %75 : vector<8x1xf32> to vector<8x8xf32>
    %77 = arith.subf %73, %76 : vector<8x8xf32>
    %78 = math.exp %77 : vector<8x8xf32>
    %cst_45 = arith.constant dense<0.000000e+00> : vector<8xf32>
    %79 = vector.multi_reduction <add>, %78, %cst_45 [1] : vector<8x8xf32> to vector<8xf32>
    %80 = vector.shape_cast %79 : vector<8xf32> to vector<8x1xf32>
    %81 = tpu.reciprocal %80 {approx = true} : vector<8x1xf32> -> vector<8x1xf32>
    %82 = vector.broadcast %81 : vector<8x1xf32> to vector<8x8xf32>
    %83 = arith.mulf %78, %82 : vector<8x8xf32>
    %cst_46 = arith.constant dense<0.000000e+00> : vector<8x8xf32>
    %84 = tpu.matmul %83, %72, %cst_46 {dimension_numbers = #tpu.dot_dimension_numbers<[1], [0], [0], [1], [0, 0, 1, 1], [], []>} : vector<8x8xf32>, vector<8x8xf32>, vector<8x8xf32> -> vector<8x8xf32>
    %c0_47 = arith.constant 0 : index
    %c24 = arith.constant 24 : index
    %85 = vector.load %arg20[%c0_47, %c24] : memref<16x96xf32, #tpu.memory_space<vmem>>, vector<8x8xf32>
    %c0_48 = arith.constant 0 : index
    %c56 = arith.constant 56 : index
    %86 = vector.load %arg20[%c0_48, %c56] : memref<16x96xf32, #tpu.memory_space<vmem>>, vector<8x8xf32>
    %c0_49 = arith.constant 0 : index
    %c88 = arith.constant 88 : index
    %87 = vector.load %arg20[%c0_49, %c88] : memref<16x96xf32, #tpu.memory_space<vmem>>, vector<8x8xf32>
    %cst_50 = arith.constant dense<0.000000e+00> : vector<8x8xf32>
    %88 = tpu.matmul %85, %86, %cst_50 {dimension_numbers = #tpu.dot_dimension_numbers<[1], [1], [0], [0], [0, 0, 1, 0], [], []>} : vector<8x8xf32>, vector<8x8xf32>, vector<8x8xf32> -> vector<8x8xf32>
    %cst_51 = arith.constant dense<0xFF800000> : vector<8xf32>
    %89 = vector.multi_reduction <maximumf>, %88, %cst_51 [1] : vector<8x8xf32> to vector<8xf32>
    %90 = vector.shape_cast %89 : vector<8xf32> to vector<8x1xf32>
    %91 = vector.broadcast %90 : vector<8x1xf32> to vector<8x8xf32>
    %92 = arith.subf %88, %91 : vector<8x8xf32>
    %93 = math.exp %92 : vector<8x8xf32>
    %cst_52 = arith.constant dense<0.000000e+00> : vector<8xf32>
    %94 = vector.multi_reduction <add>, %93, %cst_52 [1] : vector<8x8xf32> to vector<8xf32>
    %95 = vector.shape_cast %94 : vector<8xf32> to vector<8x1xf32>
    %96 = tpu.reciprocal %95 {approx = true} : vector<8x1xf32> -> vector<8x1xf32>
    %97 = vector.broadcast %96 : vector<8x1xf32> to vector<8x8xf32>
    %98 = arith.mulf %93, %97 : vector<8x8xf32>
    %cst_53 = arith.constant dense<0.000000e+00> : vector<8x8xf32>
    %99 = tpu.matmul %98, %87, %cst_53 {dimension_numbers = #tpu.dot_dimension_numbers<[1], [0], [0], [1], [0, 0, 1, 1], [], []>} : vector<8x8xf32>, vector<8x8xf32>, vector<8x8xf32> -> vector<8x8xf32>
    %100 = tpu.concatenate %54, %69, %84, %99 in 1 : vector<8x8xf32>, vector<8x8xf32>, vector<8x8xf32>, vector<8x8xf32> -> vector<8x32xf32>
    %c8_54 = arith.constant 8 : index
    %c0_55 = arith.constant 0 : index
    %101 = vector.load %arg20[%c8_54, %c0_55] : memref<16x96xf32, #tpu.memory_space<vmem>>, vector<8x8xf32>
    %c8_56 = arith.constant 8 : index
    %c32_57 = arith.constant 32 : index
    %102 = vector.load %arg20[%c8_56, %c32_57] : memref<16x96xf32, #tpu.memory_space<vmem>>, vector<8x8xf32>
    %c8_58 = arith.constant 8 : index
    %c64_59 = arith.constant 64 : index
    %103 = vector.load %arg20[%c8_58, %c64_59] : memref<16x96xf32, #tpu.memory_space<vmem>>, vector<8x8xf32>
    %cst_60 = arith.constant dense<0.000000e+00> : vector<8x8xf32>
    %104 = tpu.matmul %101, %102, %cst_60 {dimension_numbers = #tpu.dot_dimension_numbers<[1], [1], [0], [0], [0, 0, 1, 0], [], []>} : vector<8x8xf32>, vector<8x8xf32>, vector<8x8xf32> -> vector<8x8xf32>
    %cst_61 = arith.constant dense<0xFF800000> : vector<8xf32>
    %105 = vector.multi_reduction <maximumf>, %104, %cst_61 [1] : vector<8x8xf32> to vector<8xf32>
    %106 = vector.shape_cast %105 : vector<8xf32> to vector<8x1xf32>
    %107 = vector.broadcast %106 : vector<8x1xf32> to vector<8x8xf32>
    %108 = arith.subf %104, %107 : vector<8x8xf32>
    %109 = math.exp %108 : vector<8x8xf32>
    %cst_62 = arith.constant dense<0.000000e+00> : vector<8xf32>
    %110 = vector.multi_reduction <add>, %109, %cst_62 [1] : vector<8x8xf32> to vector<8xf32>
    %111 = vector.shape_cast %110 : vector<8xf32> to vector<8x1xf32>
    %112 = tpu.reciprocal %111 {approx = true} : vector<8x1xf32> -> vector<8x1xf32>
    %113 = vector.broadcast %112 : vector<8x1xf32> to vector<8x8xf32>
    %114 = arith.mulf %109, %113 : vector<8x8xf32>
    %cst_63 = arith.constant dense<0.000000e+00> : vector<8x8xf32>
    %115 = tpu.matmul %114, %103, %cst_63 {dimension_numbers = #tpu.dot_dimension_numbers<[1], [0], [0], [1], [0, 0, 1, 1], [], []>} : vector<8x8xf32>, vector<8x8xf32>, vector<8x8xf32> -> vector<8x8xf32>
    %c8_64 = arith.constant 8 : index
    %c8_65 = arith.constant 8 : index
    %116 = vector.load %arg20[%c8_64, %c8_65] : memref<16x96xf32, #tpu.memory_space<vmem>>, vector<8x8xf32>
    %c8_66 = arith.constant 8 : index
    %c40_67 = arith.constant 40 : index
    %117 = vector.load %arg20[%c8_66, %c40_67] : memref<16x96xf32, #tpu.memory_space<vmem>>, vector<8x8xf32>
    %c8_68 = arith.constant 8 : index
    %c72_69 = arith.constant 72 : index
    %118 = vector.load %arg20[%c8_68, %c72_69] : memref<16x96xf32, #tpu.memory_space<vmem>>, vector<8x8xf32>
    %cst_70 = arith.constant dense<0.000000e+00> : vector<8x8xf32>
    %119 = tpu.matmul %116, %117, %cst_70 {dimension_numbers = #tpu.dot_dimension_numbers<[1], [1], [0], [0], [0, 0, 1, 0], [], []>} : vector<8x8xf32>, vector<8x8xf32>, vector<8x8xf32> -> vector<8x8xf32>
    %cst_71 = arith.constant dense<0xFF800000> : vector<8xf32>
    %120 = vector.multi_reduction <maximumf>, %119, %cst_71 [1] : vector<8x8xf32> to vector<8xf32>
    %121 = vector.shape_cast %120 : vector<8xf32> to vector<8x1xf32>
    %122 = vector.broadcast %121 : vector<8x1xf32> to vector<8x8xf32>
    %123 = arith.subf %119, %122 : vector<8x8xf32>
    %124 = math.exp %123 : vector<8x8xf32>
    %cst_72 = arith.constant dense<0.000000e+00> : vector<8xf32>
    %125 = vector.multi_reduction <add>, %124, %cst_72 [1] : vector<8x8xf32> to vector<8xf32>
    %126 = vector.shape_cast %125 : vector<8xf32> to vector<8x1xf32>
    %127 = tpu.reciprocal %126 {approx = true} : vector<8x1xf32> -> vector<8x1xf32>
    %128 = vector.broadcast %127 : vector<8x1xf32> to vector<8x8xf32>
    %129 = arith.mulf %124, %128 : vector<8x8xf32>
    %cst_73 = arith.constant dense<0.000000e+00> : vector<8x8xf32>
    %130 = tpu.matmul %129, %118, %cst_73 {dimension_numbers = #tpu.dot_dimension_numbers<[1], [0], [0], [1], [0, 0, 1, 1], [], []>} : vector<8x8xf32>, vector<8x8xf32>, vector<8x8xf32> -> vector<8x8xf32>
    %c8_74 = arith.constant 8 : index
    %c16_75 = arith.constant 16 : index
    %131 = vector.load %arg20[%c8_74, %c16_75] : memref<16x96xf32, #tpu.memory_space<vmem>>, vector<8x8xf32>
    %c8_76 = arith.constant 8 : index
    %c48_77 = arith.constant 48 : index
    %132 = vector.load %arg20[%c8_76, %c48_77] : memref<16x96xf32, #tpu.memory_space<vmem>>, vector<8x8xf32>
    %c8_78 = arith.constant 8 : index
    %c80_79 = arith.constant 80 : index
    %133 = vector.load %arg20[%c8_78, %c80_79] : memref<16x96xf32, #tpu.memory_space<vmem>>, vector<8x8xf32>
    %cst_80 = arith.constant dense<0.000000e+00> : vector<8x8xf32>
    %134 = tpu.matmul %131, %132, %cst_80 {dimension_numbers = #tpu.dot_dimension_numbers<[1], [1], [0], [0], [0, 0, 1, 0], [], []>} : vector<8x8xf32>, vector<8x8xf32>, vector<8x8xf32> -> vector<8x8xf32>
    %cst_81 = arith.constant dense<0xFF800000> : vector<8xf32>
    %135 = vector.multi_reduction <maximumf>, %134, %cst_81 [1] : vector<8x8xf32> to vector<8xf32>
    %136 = vector.shape_cast %135 : vector<8xf32> to vector<8x1xf32>
    %137 = vector.broadcast %136 : vector<8x1xf32> to vector<8x8xf32>
    %138 = arith.subf %134, %137 : vector<8x8xf32>
    %139 = math.exp %138 : vector<8x8xf32>
    %cst_82 = arith.constant dense<0.000000e+00> : vector<8xf32>
    %140 = vector.multi_reduction <add>, %139, %cst_82 [1] : vector<8x8xf32> to vector<8xf32>
    %141 = vector.shape_cast %140 : vector<8xf32> to vector<8x1xf32>
    %142 = tpu.reciprocal %141 {approx = true} : vector<8x1xf32> -> vector<8x1xf32>
    %143 = vector.broadcast %142 : vector<8x1xf32> to vector<8x8xf32>
    %144 = arith.mulf %139, %143 : vector<8x8xf32>
    %cst_83 = arith.constant dense<0.000000e+00> : vector<8x8xf32>
    %145 = tpu.matmul %144, %133, %cst_83 {dimension_numbers = #tpu.dot_dimension_numbers<[1], [0], [0], [1], [0, 0, 1, 1], [], []>} : vector<8x8xf32>, vector<8x8xf32>, vector<8x8xf32> -> vector<8x8xf32>
    %c8_84 = arith.constant 8 : index
    %c24_85 = arith.constant 24 : index
    %146 = vector.load %arg20[%c8_84, %c24_85] : memref<16x96xf32, #tpu.memory_space<vmem>>, vector<8x8xf32>
    %c8_86 = arith.constant 8 : index
    %c56_87 = arith.constant 56 : index
    %147 = vector.load %arg20[%c8_86, %c56_87] : memref<16x96xf32, #tpu.memory_space<vmem>>, vector<8x8xf32>
    %c8_88 = arith.constant 8 : index
    %c88_89 = arith.constant 88 : index
    %148 = vector.load %arg20[%c8_88, %c88_89] : memref<16x96xf32, #tpu.memory_space<vmem>>, vector<8x8xf32>
    %cst_90 = arith.constant dense<0.000000e+00> : vector<8x8xf32>
    %149 = tpu.matmul %146, %147, %cst_90 {dimension_numbers = #tpu.dot_dimension_numbers<[1], [1], [0], [0], [0, 0, 1, 0], [], []>} : vector<8x8xf32>, vector<8x8xf32>, vector<8x8xf32> -> vector<8x8xf32>
    %cst_91 = arith.constant dense<0xFF800000> : vector<8xf32>
    %150 = vector.multi_reduction <maximumf>, %149, %cst_91 [1] : vector<8x8xf32> to vector<8xf32>
    %151 = vector.shape_cast %150 : vector<8xf32> to vector<8x1xf32>
    %152 = vector.broadcast %151 : vector<8x1xf32> to vector<8x8xf32>
    %153 = arith.subf %149, %152 : vector<8x8xf32>
    %154 = math.exp %153 : vector<8x8xf32>
    %cst_92 = arith.constant dense<0.000000e+00> : vector<8xf32>
    %155 = vector.multi_reduction <add>, %154, %cst_92 [1] : vector<8x8xf32> to vector<8xf32>
    %156 = vector.shape_cast %155 : vector<8xf32> to vector<8x1xf32>
    %157 = tpu.reciprocal %156 {approx = true} : vector<8x1xf32> -> vector<8x1xf32>
    %158 = vector.broadcast %157 : vector<8x1xf32> to vector<8x8xf32>
    %159 = arith.mulf %154, %158 : vector<8x8xf32>
    %cst_93 = arith.constant dense<0.000000e+00> : vector<8x8xf32>
    %160 = tpu.matmul %159, %148, %cst_93 {dimension_numbers = #tpu.dot_dimension_numbers<[1], [0], [0], [1], [0, 0, 1, 1], [], []>} : vector<8x8xf32>, vector<8x8xf32>, vector<8x8xf32> -> vector<8x8xf32>
    %161 = tpu.concatenate %115, %130, %145, %160 in 1 : vector<8x8xf32>, vector<8x8xf32>, vector<8x8xf32>, vector<8x8xf32> -> vector<8x32xf32>
    %162 = tpu.concatenate %100, %161 in 0 : vector<8x32xf32>, vector<8x32xf32> -> vector<16x32xf32>
    %c0_94 = arith.constant 0 : index
    %c0_95 = arith.constant 0 : index
    %c0_96 = arith.constant 0 : index
    %163 = vector.load %arg7[%c0_94, %c0_95, %c0_96] : memref<2x32x32xf32, #tpu.memory_space<vmem>>, vector<1x32x32xf32>
    %164 = vector.shape_cast %163 : vector<1x32x32xf32> to vector<32x32xf32>
    %cst_97 = arith.constant dense<0.000000e+00> : vector<16x32xf32>
    %165 = tpu.matmul %162, %164, %cst_97 {dimension_numbers = #tpu.dot_dimension_numbers<[1], [0], [0], [1], [0, 0, 1, 1], [], []>} : vector<16x32xf32>, vector<32x32xf32>, vector<16x32xf32> -> vector<16x32xf32>
    %c0_98 = arith.constant 0 : index
    %c0_99 = arith.constant 0 : index
    %c0_100 = arith.constant 0 : index
    %166 = vector.load %arg8[%c0_98, %c0_99, %c0_100] : memref<2x1x32xf32, #tpu.memory_space<vmem>>, vector<1x1x32xf32>
    %167 = vector.shape_cast %166 : vector<1x1x32xf32> to vector<1x32xf32>
    %168 = vector.broadcast %167 : vector<1x32xf32> to vector<16x32xf32>
    %169 = arith.addf %165, %168 : vector<16x32xf32>
    %170 = arith.addf %31, %169 : vector<16x32xf32>
    %c0_101 = arith.constant 0 : index
    %c0_102 = arith.constant 0 : index
    %c0_103 = arith.constant 0 : index
    %171 = vector.load %arg9[%c0_101, %c0_102, %c0_103] : memref<2x1x32xf32, #tpu.memory_space<vmem>>, vector<1x1x32xf32>
    %172 = vector.shape_cast %171 : vector<1x1x32xf32> to vector<1x32xf32>
    %c0_104 = arith.constant 0 : index
    %c0_105 = arith.constant 0 : index
    %c0_106 = arith.constant 0 : index
    %173 = vector.load %arg10[%c0_104, %c0_105, %c0_106] : memref<2x1x32xf32, #tpu.memory_space<vmem>>, vector<1x1x32xf32>
    %174 = vector.shape_cast %173 : vector<1x1x32xf32> to vector<1x32xf32>
    %cst_107 = arith.constant dense<0.000000e+00> : vector<16xf32>
    %175 = vector.multi_reduction <add>, %170, %cst_107 [1] : vector<16x32xf32> to vector<16xf32>
    %176 = vector.shape_cast %175 : vector<16xf32> to vector<16x1xf32>
    %cst_108 = arith.constant 3.200000e+01 : f32
    %177 = vector.broadcast %cst_108 : f32 to vector<16x1xf32>
    %178 = arith.divf %176, %177 : vector<16x1xf32>
    %179 = vector.broadcast %178 : vector<16x1xf32> to vector<16x32xf32>
    %180 = arith.subf %170, %179 : vector<16x32xf32>
    %181 = arith.mulf %180, %180 : vector<16x32xf32>
    %cst_109 = arith.constant dense<0.000000e+00> : vector<16xf32>
    %182 = vector.multi_reduction <add>, %181, %cst_109 [1] : vector<16x32xf32> to vector<16xf32>
    %183 = vector.shape_cast %182 : vector<16xf32> to vector<16x1xf32>
    %cst_110 = arith.constant 3.200000e+01 : f32
    %184 = vector.broadcast %cst_110 : f32 to vector<16x1xf32>
    %185 = arith.divf %183, %184 : vector<16x1xf32>
    %186 = vector.broadcast %178 : vector<16x1xf32> to vector<16x32xf32>
    %187 = arith.subf %170, %186 : vector<16x32xf32>
    %cst_111 = arith.constant 9.99999974E-6 : f32
    %188 = vector.broadcast %cst_111 : f32 to vector<16x1xf32>
    %189 = arith.addf %185, %188 : vector<16x1xf32>
    %190 = math.rsqrt %189 : vector<16x1xf32>
    %191 = vector.broadcast %190 : vector<16x1xf32> to vector<16x32xf32>
    %192 = arith.mulf %187, %191 : vector<16x32xf32>
    %193 = vector.broadcast %172 : vector<1x32xf32> to vector<16x32xf32>
    %194 = arith.mulf %192, %193 : vector<16x32xf32>
    %195 = vector.broadcast %174 : vector<1x32xf32> to vector<16x32xf32>
    %196 = arith.addf %194, %195 : vector<16x32xf32>
    %c0_112 = arith.constant 0 : index
    %c0_113 = arith.constant 0 : index
    %c0_114 = arith.constant 0 : index
    %197 = vector.load %arg11[%c0_112, %c0_113, %c0_114] : memref<2x32x64xf32, #tpu.memory_space<vmem>>, vector<1x32x64xf32>
    %198 = vector.shape_cast %197 : vector<1x32x64xf32> to vector<32x64xf32>
    %cst_115 = arith.constant dense<0.000000e+00> : vector<16x64xf32>
    %199 = tpu.matmul %196, %198, %cst_115 {dimension_numbers = #tpu.dot_dimension_numbers<[1], [0], [0], [1], [0, 0, 1, 1], [], []>} : vector<16x32xf32>, vector<32x64xf32>, vector<16x64xf32> -> vector<16x64xf32>
    %c0_116 = arith.constant 0 : index
    %c0_117 = arith.constant 0 : index
    %c0_118 = arith.constant 0 : index
    %200 = vector.load %arg12[%c0_116, %c0_117, %c0_118] : memref<2x1x64xf32, #tpu.memory_space<vmem>>, vector<1x1x64xf32>
    %201 = vector.shape_cast %200 : vector<1x1x64xf32> to vector<1x64xf32>
    %202 = vector.broadcast %201 : vector<1x64xf32> to vector<16x64xf32>
    %203 = arith.addf %199, %202 : vector<16x64xf32>
    %cst_119 = arith.constant 0.000000e+00 : f32
    %204 = vector.broadcast %cst_119 : f32 to vector<16x64xf32>
    %205 = arith.maximumf %203, %204 : vector<16x64xf32>
    %c0_120 = arith.constant 0 : index
    %c0_121 = arith.constant 0 : index
    %c0_122 = arith.constant 0 : index
    %206 = vector.load %arg13[%c0_120, %c0_121, %c0_122] : memref<2x64x32xf32, #tpu.memory_space<vmem>>, vector<1x64x32xf32>
    %207 = vector.shape_cast %206 : vector<1x64x32xf32> to vector<64x32xf32>
    %cst_123 = arith.constant dense<0.000000e+00> : vector<16x32xf32>
    %208 = tpu.matmul %205, %207, %cst_123 {dimension_numbers = #tpu.dot_dimension_numbers<[1], [0], [0], [1], [0, 0, 1, 1], [], []>} : vector<16x64xf32>, vector<64x32xf32>, vector<16x32xf32> -> vector<16x32xf32>
    %c0_124 = arith.constant 0 : index
    %c0_125 = arith.constant 0 : index
    %c0_126 = arith.constant 0 : index
    %209 = vector.load %arg14[%c0_124, %c0_125, %c0_126] : memref<2x1x32xf32, #tpu.memory_space<vmem>>, vector<1x1x32xf32>
    %210 = vector.shape_cast %209 : vector<1x1x32xf32> to vector<1x32xf32>
    %211 = vector.broadcast %210 : vector<1x32xf32> to vector<16x32xf32>
    %212 = arith.addf %208, %211 : vector<16x32xf32>
    %213 = arith.addf %196, %212 : vector<16x32xf32>
    %c1 = arith.constant 1 : index
    %c0_127 = arith.constant 0 : index
    %c0_128 = arith.constant 0 : index
    %214 = vector.load %arg3[%c1, %c0_127, %c0_128] : memref<2x1x32xf32, #tpu.memory_space<vmem>>, vector<1x1x32xf32>
    %215 = vector.shape_cast %214 : vector<1x1x32xf32> to vector<1x32xf32>
    %c1_129 = arith.constant 1 : index
    %c0_130 = arith.constant 0 : index
    %c0_131 = arith.constant 0 : index
    %216 = vector.load %arg4[%c1_129, %c0_130, %c0_131] : memref<2x1x32xf32, #tpu.memory_space<vmem>>, vector<1x1x32xf32>
    %217 = vector.shape_cast %216 : vector<1x1x32xf32> to vector<1x32xf32>
    %cst_132 = arith.constant dense<0.000000e+00> : vector<16xf32>
    %218 = vector.multi_reduction <add>, %213, %cst_132 [1] : vector<16x32xf32> to vector<16xf32>
    %219 = vector.shape_cast %218 : vector<16xf32> to vector<16x1xf32>
    %cst_133 = arith.constant 3.200000e+01 : f32
    %220 = vector.broadcast %cst_133 : f32 to vector<16x1xf32>
    %221 = arith.divf %219, %220 : vector<16x1xf32>
    %222 = vector.broadcast %221 : vector<16x1xf32> to vector<16x32xf32>
    %223 = arith.subf %213, %222 : vector<16x32xf32>
    %224 = arith.mulf %223, %223 : vector<16x32xf32>
    %cst_134 = arith.constant dense<0.000000e+00> : vector<16xf32>
    %225 = vector.multi_reduction <add>, %224, %cst_134 [1] : vector<16x32xf32> to vector<16xf32>
    %226 = vector.shape_cast %225 : vector<16xf32> to vector<16x1xf32>
    %cst_135 = arith.constant 3.200000e+01 : f32
    %227 = vector.broadcast %cst_135 : f32 to vector<16x1xf32>
    %228 = arith.divf %226, %227 : vector<16x1xf32>
    %229 = vector.broadcast %221 : vector<16x1xf32> to vector<16x32xf32>
    %230 = arith.subf %213, %229 : vector<16x32xf32>
    %cst_136 = arith.constant 9.99999974E-6 : f32
    %231 = vector.broadcast %cst_136 : f32 to vector<16x1xf32>
    %232 = arith.addf %228, %231 : vector<16x1xf32>
    %233 = math.rsqrt %232 : vector<16x1xf32>
    %234 = vector.broadcast %233 : vector<16x1xf32> to vector<16x32xf32>
    %235 = arith.mulf %230, %234 : vector<16x32xf32>
    %236 = vector.broadcast %215 : vector<1x32xf32> to vector<16x32xf32>
    %237 = arith.mulf %235, %236 : vector<16x32xf32>
    %238 = vector.broadcast %217 : vector<1x32xf32> to vector<16x32xf32>
    %239 = arith.addf %237, %238 : vector<16x32xf32>
    %c1_137 = arith.constant 1 : index
    %c0_138 = arith.constant 0 : index
    %c0_139 = arith.constant 0 : index
    %240 = vector.load %arg5[%c1_137, %c0_138, %c0_139] : memref<2x32x96xf32, #tpu.memory_space<vmem>>, vector<1x32x96xf32>
    %241 = vector.shape_cast %240 : vector<1x32x96xf32> to vector<32x96xf32>
    %cst_140 = arith.constant dense<0.000000e+00> : vector<16x96xf32>
    %242 = tpu.matmul %239, %241, %cst_140 {dimension_numbers = #tpu.dot_dimension_numbers<[1], [0], [0], [1], [0, 0, 1, 1], [], []>} : vector<16x32xf32>, vector<32x96xf32>, vector<16x96xf32> -> vector<16x96xf32>
    %c1_141 = arith.constant 1 : index
    %c0_142 = arith.constant 0 : index
    %c0_143 = arith.constant 0 : index
    %243 = vector.load %arg6[%c1_141, %c0_142, %c0_143] : memref<2x1x96xf32, #tpu.memory_space<vmem>>, vector<1x1x96xf32>
    %244 = vector.shape_cast %243 : vector<1x1x96xf32> to vector<1x96xf32>
    %245 = vector.broadcast %244 : vector<1x96xf32> to vector<16x96xf32>
    %246 = arith.addf %242, %245 : vector<16x96xf32>
    %c0_144 = arith.constant 0 : index
    %c0_145 = arith.constant 0 : index
    %247 = vector.load %arg20[%c0_144, %c0_145] : memref<16x96xf32, #tpu.memory_space<vmem>>, vector<16x96xf32>
    tpu.vector_store %arg20[%c0_144, %c0_145], %246 {strides = array<i32>} : memref<16x96xf32, #tpu.memory_space<vmem>>, vector<16x96xf32>,
    %c0_146 = arith.constant 0 : index
    %c0_147 = arith.constant 0 : index
    %248 = vector.load %arg20[%c0_146, %c0_147] : memref<16x96xf32, #tpu.memory_space<vmem>>, vector<8x8xf32>
    %c0_148 = arith.constant 0 : index
    %c32_149 = arith.constant 32 : index
    %249 = vector.load %arg20[%c0_148, %c32_149] : memref<16x96xf32, #tpu.memory_space<vmem>>, vector<8x8xf32>
    %c0_150 = arith.constant 0 : index
    %c64_151 = arith.constant 64 : index
    %250 = vector.load %arg20[%c0_150, %c64_151] : memref<16x96xf32, #tpu.memory_space<vmem>>, vector<8x8xf32>
    %cst_152 = arith.constant dense<0.000000e+00> : vector<8x8xf32>
    %251 = tpu.matmul %248, %249, %cst_152 {dimension_numbers = #tpu.dot_dimension_numbers<[1], [1], [0], [0], [0, 0, 1, 0], [], []>} : vector<8x8xf32>, vector<8x8xf32>, vector<8x8xf32> -> vector<8x8xf32>
    %cst_153 = arith.constant dense<0xFF800000> : vector<8xf32>
    %252 = vector.multi_reduction <maximumf>, %251, %cst_153 [1] : vector<8x8xf32> to vector<8xf32>
    %253 = vector.shape_cast %252 : vector<8xf32> to vector<8x1xf32>
    %254 = vector.broadcast %253 : vector<8x1xf32> to vector<8x8xf32>
    %255 = arith.subf %251, %254 : vector<8x8xf32>
    %256 = math.exp %255 : vector<8x8xf32>
    %cst_154 = arith.constant dense<0.000000e+00> : vector<8xf32>
    %257 = vector.multi_reduction <add>, %256, %cst_154 [1] : vector<8x8xf32> to vector<8xf32>
    %258 = vector.shape_cast %257 : vector<8xf32> to vector<8x1xf32>
    %259 = tpu.reciprocal %258 {approx = true} : vector<8x1xf32> -> vector<8x1xf32>
    %260 = vector.broadcast %259 : vector<8x1xf32> to vector<8x8xf32>
    %261 = arith.mulf %256, %260 : vector<8x8xf32>
    %cst_155 = arith.constant dense<0.000000e+00> : vector<8x8xf32>
    %262 = tpu.matmul %261, %250, %cst_155 {dimension_numbers = #tpu.dot_dimension_numbers<[1], [0], [0], [1], [0, 0, 1, 1], [], []>} : vector<8x8xf32>, vector<8x8xf32>, vector<8x8xf32> -> vector<8x8xf32>
    %c0_156 = arith.constant 0 : index
    %c8_157 = arith.constant 8 : index
    %263 = vector.load %arg20[%c0_156, %c8_157] : memref<16x96xf32, #tpu.memory_space<vmem>>, vector<8x8xf32>
    %c0_158 = arith.constant 0 : index
    %c40_159 = arith.constant 40 : index
    %264 = vector.load %arg20[%c0_158, %c40_159] : memref<16x96xf32, #tpu.memory_space<vmem>>, vector<8x8xf32>
    %c0_160 = arith.constant 0 : index
    %c72_161 = arith.constant 72 : index
    %265 = vector.load %arg20[%c0_160, %c72_161] : memref<16x96xf32, #tpu.memory_space<vmem>>, vector<8x8xf32>
    %cst_162 = arith.constant dense<0.000000e+00> : vector<8x8xf32>
    %266 = tpu.matmul %263, %264, %cst_162 {dimension_numbers = #tpu.dot_dimension_numbers<[1], [1], [0], [0], [0, 0, 1, 0], [], []>} : vector<8x8xf32>, vector<8x8xf32>, vector<8x8xf32> -> vector<8x8xf32>
    %cst_163 = arith.constant dense<0xFF800000> : vector<8xf32>
    %267 = vector.multi_reduction <maximumf>, %266, %cst_163 [1] : vector<8x8xf32> to vector<8xf32>
    %268 = vector.shape_cast %267 : vector<8xf32> to vector<8x1xf32>
    %269 = vector.broadcast %268 : vector<8x1xf32> to vector<8x8xf32>
    %270 = arith.subf %266, %269 : vector<8x8xf32>
    %271 = math.exp %270 : vector<8x8xf32>
    %cst_164 = arith.constant dense<0.000000e+00> : vector<8xf32>
    %272 = vector.multi_reduction <add>, %271, %cst_164 [1] : vector<8x8xf32> to vector<8xf32>
    %273 = vector.shape_cast %272 : vector<8xf32> to vector<8x1xf32>
    %274 = tpu.reciprocal %273 {approx = true} : vector<8x1xf32> -> vector<8x1xf32>
    %275 = vector.broadcast %274 : vector<8x1xf32> to vector<8x8xf32>
    %276 = arith.mulf %271, %275 : vector<8x8xf32>
    %cst_165 = arith.constant dense<0.000000e+00> : vector<8x8xf32>
    %277 = tpu.matmul %276, %265, %cst_165 {dimension_numbers = #tpu.dot_dimension_numbers<[1], [0], [0], [1], [0, 0, 1, 1], [], []>} : vector<8x8xf32>, vector<8x8xf32>, vector<8x8xf32> -> vector<8x8xf32>
    %c0_166 = arith.constant 0 : index
    %c16_167 = arith.constant 16 : index
    %278 = vector.load %arg20[%c0_166, %c16_167] : memref<16x96xf32, #tpu.memory_space<vmem>>, vector<8x8xf32>
    %c0_168 = arith.constant 0 : index
    %c48_169 = arith.constant 48 : index
    %279 = vector.load %arg20[%c0_168, %c48_169] : memref<16x96xf32, #tpu.memory_space<vmem>>, vector<8x8xf32>
    %c0_170 = arith.constant 0 : index
    %c80_171 = arith.constant 80 : index
    %280 = vector.load %arg20[%c0_170, %c80_171] : memref<16x96xf32, #tpu.memory_space<vmem>>, vector<8x8xf32>
    %cst_172 = arith.constant dense<0.000000e+00> : vector<8x8xf32>
    %281 = tpu.matmul %278, %279, %cst_172 {dimension_numbers = #tpu.dot_dimension_numbers<[1], [1], [0], [0], [0, 0, 1, 0], [], []>} : vector<8x8xf32>, vector<8x8xf32>, vector<8x8xf32> -> vector<8x8xf32>
    %cst_173 = arith.constant dense<0xFF800000> : vector<8xf32>
    %282 = vector.multi_reduction <maximumf>, %281, %cst_173 [1] : vector<8x8xf32> to vector<8xf32>
    %283 = vector.shape_cast %282 : vector<8xf32> to vector<8x1xf32>
    %284 = vector.broadcast %283 : vector<8x1xf32> to vector<8x8xf32>
    %285 = arith.subf %281, %284 : vector<8x8xf32>
    %286 = math.exp %285 : vector<8x8xf32>
    %cst_174 = arith.constant dense<0.000000e+00> : vector<8xf32>
    %287 = vector.multi_reduction <add>, %286, %cst_174 [1] : vector<8x8xf32> to vector<8xf32>
    %288 = vector.shape_cast %287 : vector<8xf32> to vector<8x1xf32>
    %289 = tpu.reciprocal %288 {approx = true} : vector<8x1xf32> -> vector<8x1xf32>
    %290 = vector.broadcast %289 : vector<8x1xf32> to vector<8x8xf32>
    %291 = arith.mulf %286, %290 : vector<8x8xf32>
    %cst_175 = arith.constant dense<0.000000e+00> : vector<8x8xf32>
    %292 = tpu.matmul %291, %280, %cst_175 {dimension_numbers = #tpu.dot_dimension_numbers<[1], [0], [0], [1], [0, 0, 1, 1], [], []>} : vector<8x8xf32>, vector<8x8xf32>, vector<8x8xf32> -> vector<8x8xf32>
    %c0_176 = arith.constant 0 : index
    %c24_177 = arith.constant 24 : index
    %293 = vector.load %arg20[%c0_176, %c24_177] : memref<16x96xf32, #tpu.memory_space<vmem>>, vector<8x8xf32>
    %c0_178 = arith.constant 0 : index
    %c56_179 = arith.constant 56 : index
    %294 = vector.load %arg20[%c0_178, %c56_179] : memref<16x96xf32, #tpu.memory_space<vmem>>, vector<8x8xf32>
    %c0_180 = arith.constant 0 : index
    %c88_181 = arith.constant 88 : index
    %295 = vector.load %arg20[%c0_180, %c88_181] : memref<16x96xf32, #tpu.memory_space<vmem>>, vector<8x8xf32>
    %cst_182 = arith.constant dense<0.000000e+00> : vector<8x8xf32>
    %296 = tpu.matmul %293, %294, %cst_182 {dimension_numbers = #tpu.dot_dimension_numbers<[1], [1], [0], [0], [0, 0, 1, 0], [], []>} : vector<8x8xf32>, vector<8x8xf32>, vector<8x8xf32> -> vector<8x8xf32>
    %cst_183 = arith.constant dense<0xFF800000> : vector<8xf32>
    %297 = vector.multi_reduction <maximumf>, %296, %cst_183 [1] : vector<8x8xf32> to vector<8xf32>
    %298 = vector.shape_cast %297 : vector<8xf32> to vector<8x1xf32>
    %299 = vector.broadcast %298 : vector<8x1xf32> to vector<8x8xf32>
    %300 = arith.subf %296, %299 : vector<8x8xf32>
    %301 = math.exp %300 : vector<8x8xf32>
    %cst_184 = arith.constant dense<0.000000e+00> : vector<8xf32>
    %302 = vector.multi_reduction <add>, %301, %cst_184 [1] : vector<8x8xf32> to vector<8xf32>
    %303 = vector.shape_cast %302 : vector<8xf32> to vector<8x1xf32>
    %304 = tpu.reciprocal %303 {approx = true} : vector<8x1xf32> -> vector<8x1xf32>
    %305 = vector.broadcast %304 : vector<8x1xf32> to vector<8x8xf32>
    %306 = arith.mulf %301, %305 : vector<8x8xf32>
    %cst_185 = arith.constant dense<0.000000e+00> : vector<8x8xf32>
    %307 = tpu.matmul %306, %295, %cst_185 {dimension_numbers = #tpu.dot_dimension_numbers<[1], [0], [0], [1], [0, 0, 1, 1], [], []>} : vector<8x8xf32>, vector<8x8xf32>, vector<8x8xf32> -> vector<8x8xf32>
    %308 = tpu.concatenate %262, %277, %292, %307 in 1 : vector<8x8xf32>, vector<8x8xf32>, vector<8x8xf32>, vector<8x8xf32> -> vector<8x32xf32>
    %c8_186 = arith.constant 8 : index
    %c0_187 = arith.constant 0 : index
    %309 = vector.load %arg20[%c8_186, %c0_187] : memref<16x96xf32, #tpu.memory_space<vmem>>, vector<8x8xf32>
    %c8_188 = arith.constant 8 : index
    %c32_189 = arith.constant 32 : index
    %310 = vector.load %arg20[%c8_188, %c32_189] : memref<16x96xf32, #tpu.memory_space<vmem>>, vector<8x8xf32>
    %c8_190 = arith.constant 8 : index
    %c64_191 = arith.constant 64 : index
    %311 = vector.load %arg20[%c8_190, %c64_191] : memref<16x96xf32, #tpu.memory_space<vmem>>, vector<8x8xf32>
    %cst_192 = arith.constant dense<0.000000e+00> : vector<8x8xf32>
    %312 = tpu.matmul %309, %310, %cst_192 {dimension_numbers = #tpu.dot_dimension_numbers<[1], [1], [0], [0], [0, 0, 1, 0], [], []>} : vector<8x8xf32>, vector<8x8xf32>, vector<8x8xf32> -> vector<8x8xf32>
    %cst_193 = arith.constant dense<0xFF800000> : vector<8xf32>
    %313 = vector.multi_reduction <maximumf>, %312, %cst_193 [1] : vector<8x8xf32> to vector<8xf32>
    %314 = vector.shape_cast %313 : vector<8xf32> to vector<8x1xf32>
    %315 = vector.broadcast %314 : vector<8x1xf32> to vector<8x8xf32>
    %316 = arith.subf %312, %315 : vector<8x8xf32>
    %317 = math.exp %316 : vector<8x8xf32>
    %cst_194 = arith.constant dense<0.000000e+00> : vector<8xf32>
    %318 = vector.multi_reduction <add>, %317, %cst_194 [1] : vector<8x8xf32> to vector<8xf32>
    %319 = vector.shape_cast %318 : vector<8xf32> to vector<8x1xf32>
    %320 = tpu.reciprocal %319 {approx = true} : vector<8x1xf32> -> vector<8x1xf32>
    %321 = vector.broadcast %320 : vector<8x1xf32> to vector<8x8xf32>
    %322 = arith.mulf %317, %321 : vector<8x8xf32>
    %cst_195 = arith.constant dense<0.000000e+00> : vector<8x8xf32>
    %323 = tpu.matmul %322, %311, %cst_195 {dimension_numbers = #tpu.dot_dimension_numbers<[1], [0], [0], [1], [0, 0, 1, 1], [], []>} : vector<8x8xf32>, vector<8x8xf32>, vector<8x8xf32> -> vector<8x8xf32>
    %c8_196 = arith.constant 8 : index
    %c8_197 = arith.constant 8 : index
    %324 = vector.load %arg20[%c8_196, %c8_197] : memref<16x96xf32, #tpu.memory_space<vmem>>, vector<8x8xf32>
    %c8_198 = arith.constant 8 : index
    %c40_199 = arith.constant 40 : index
    %325 = vector.load %arg20[%c8_198, %c40_199] : memref<16x96xf32, #tpu.memory_space<vmem>>, vector<8x8xf32>
    %c8_200 = arith.constant 8 : index
    %c72_201 = arith.constant 72 : index
    %326 = vector.load %arg20[%c8_200, %c72_201] : memref<16x96xf32, #tpu.memory_space<vmem>>, vector<8x8xf32>
    %cst_202 = arith.constant dense<0.000000e+00> : vector<8x8xf32>
    %327 = tpu.matmul %324, %325, %cst_202 {dimension_numbers = #tpu.dot_dimension_numbers<[1], [1], [0], [0], [0, 0, 1, 0], [], []>} : vector<8x8xf32>, vector<8x8xf32>, vector<8x8xf32> -> vector<8x8xf32>
    %cst_203 = arith.constant dense<0xFF800000> : vector<8xf32>
    %328 = vector.multi_reduction <maximumf>, %327, %cst_203 [1] : vector<8x8xf32> to vector<8xf32>
    %329 = vector.shape_cast %328 : vector<8xf32> to vector<8x1xf32>
    %330 = vector.broadcast %329 : vector<8x1xf32> to vector<8x8xf32>
    %331 = arith.subf %327, %330 : vector<8x8xf32>
    %332 = math.exp %331 : vector<8x8xf32>
    %cst_204 = arith.constant dense<0.000000e+00> : vector<8xf32>
    %333 = vector.multi_reduction <add>, %332, %cst_204 [1] : vector<8x8xf32> to vector<8xf32>
    %334 = vector.shape_cast %333 : vector<8xf32> to vector<8x1xf32>
    %335 = tpu.reciprocal %334 {approx = true} : vector<8x1xf32> -> vector<8x1xf32>
    %336 = vector.broadcast %335 : vector<8x1xf32> to vector<8x8xf32>
    %337 = arith.mulf %332, %336 : vector<8x8xf32>
    %cst_205 = arith.constant dense<0.000000e+00> : vector<8x8xf32>
    %338 = tpu.matmul %337, %326, %cst_205 {dimension_numbers = #tpu.dot_dimension_numbers<[1], [0], [0], [1], [0, 0, 1, 1], [], []>} : vector<8x8xf32>, vector<8x8xf32>, vector<8x8xf32> -> vector<8x8xf32>
    %c8_206 = arith.constant 8 : index
    %c16_207 = arith.constant 16 : index
    %339 = vector.load %arg20[%c8_206, %c16_207] : memref<16x96xf32, #tpu.memory_space<vmem>>, vector<8x8xf32>
    %c8_208 = arith.constant 8 : index
    %c48_209 = arith.constant 48 : index
    %340 = vector.load %arg20[%c8_208, %c48_209] : memref<16x96xf32, #tpu.memory_space<vmem>>, vector<8x8xf32>
    %c8_210 = arith.constant 8 : index
    %c80_211 = arith.constant 80 : index
    %341 = vector.load %arg20[%c8_210, %c80_211] : memref<16x96xf32, #tpu.memory_space<vmem>>, vector<8x8xf32>
    %cst_212 = arith.constant dense<0.000000e+00> : vector<8x8xf32>
    %342 = tpu.matmul %339, %340, %cst_212 {dimension_numbers = #tpu.dot_dimension_numbers<[1], [1], [0], [0], [0, 0, 1, 0], [], []>} : vector<8x8xf32>, vector<8x8xf32>, vector<8x8xf32> -> vector<8x8xf32>
    %cst_213 = arith.constant dense<0xFF800000> : vector<8xf32>
    %343 = vector.multi_reduction <maximumf>, %342, %cst_213 [1] : vector<8x8xf32> to vector<8xf32>
    %344 = vector.shape_cast %343 : vector<8xf32> to vector<8x1xf32>
    %345 = vector.broadcast %344 : vector<8x1xf32> to vector<8x8xf32>
    %346 = arith.subf %342, %345 : vector<8x8xf32>
    %347 = math.exp %346 : vector<8x8xf32>
    %cst_214 = arith.constant dense<0.000000e+00> : vector<8xf32>
    %348 = vector.multi_reduction <add>, %347, %cst_214 [1] : vector<8x8xf32> to vector<8xf32>
    %349 = vector.shape_cast %348 : vector<8xf32> to vector<8x1xf32>
    %350 = tpu.reciprocal %349 {approx = true} : vector<8x1xf32> -> vector<8x1xf32>
    %351 = vector.broadcast %350 : vector<8x1xf32> to vector<8x8xf32>
    %352 = arith.mulf %347, %351 : vector<8x8xf32>
    %cst_215 = arith.constant dense<0.000000e+00> : vector<8x8xf32>
    %353 = tpu.matmul %352, %341, %cst_215 {dimension_numbers = #tpu.dot_dimension_numbers<[1], [0], [0], [1], [0, 0, 1, 1], [], []>} : vector<8x8xf32>, vector<8x8xf32>, vector<8x8xf32> -> vector<8x8xf32>
    %c8_216 = arith.constant 8 : index
    %c24_217 = arith.constant 24 : index
    %354 = vector.load %arg20[%c8_216, %c24_217] : memref<16x96xf32, #tpu.memory_space<vmem>>, vector<8x8xf32>
    %c8_218 = arith.constant 8 : index
    %c56_219 = arith.constant 56 : index
    %355 = vector.load %arg20[%c8_218, %c56_219] : memref<16x96xf32, #tpu.memory_space<vmem>>, vector<8x8xf32>
    %c8_220 = arith.constant 8 : index
    %c88_221 = arith.constant 88 : index
    %356 = vector.load %arg20[%c8_220, %c88_221] : memref<16x96xf32, #tpu.memory_space<vmem>>, vector<8x8xf32>
    %cst_222 = arith.constant dense<0.000000e+00> : vector<8x8xf32>
    %357 = tpu.matmul %354, %355, %cst_222 {dimension_numbers = #tpu.dot_dimension_numbers<[1], [1], [0], [0], [0, 0, 1, 0], [], []>} : vector<8x8xf32>, vector<8x8xf32>, vector<8x8xf32> -> vector<8x8xf32>
    %cst_223 = arith.constant dense<0xFF800000> : vector<8xf32>
    %358 = vector.multi_reduction <maximumf>, %357, %cst_223 [1] : vector<8x8xf32> to vector<8xf32>
    %359 = vector.shape_cast %358 : vector<8xf32> to vector<8x1xf32>
    %360 = vector.broadcast %359 : vector<8x1xf32> to vector<8x8xf32>
    %361 = arith.subf %357, %360 : vector<8x8xf32>
    %362 = math.exp %361 : vector<8x8xf32>
    %cst_224 = arith.constant dense<0.000000e+00> : vector<8xf32>
    %363 = vector.multi_reduction <add>, %362, %cst_224 [1] : vector<8x8xf32> to vector<8xf32>
    %364 = vector.shape_cast %363 : vector<8xf32> to vector<8x1xf32>
    %365 = tpu.reciprocal %364 {approx = true} : vector<8x1xf32> -> vector<8x1xf32>
    %366 = vector.broadcast %365 : vector<8x1xf32> to vector<8x8xf32>
    %367 = arith.mulf %362, %366 : vector<8x8xf32>
    %cst_225 = arith.constant dense<0.000000e+00> : vector<8x8xf32>
    %368 = tpu.matmul %367, %356, %cst_225 {dimension_numbers = #tpu.dot_dimension_numbers<[1], [0], [0], [1], [0, 0, 1, 1], [], []>} : vector<8x8xf32>, vector<8x8xf32>, vector<8x8xf32> -> vector<8x8xf32>
    %369 = tpu.concatenate %323, %338, %353, %368 in 1 : vector<8x8xf32>, vector<8x8xf32>, vector<8x8xf32>, vector<8x8xf32> -> vector<8x32xf32>
    %370 = tpu.concatenate %308, %369 in 0 : vector<8x32xf32>, vector<8x32xf32> -> vector<16x32xf32>
    %c1_226 = arith.constant 1 : index
    %c0_227 = arith.constant 0 : index
    %c0_228 = arith.constant 0 : index
    %371 = vector.load %arg7[%c1_226, %c0_227, %c0_228] : memref<2x32x32xf32, #tpu.memory_space<vmem>>, vector<1x32x32xf32>
    %372 = vector.shape_cast %371 : vector<1x32x32xf32> to vector<32x32xf32>
    %cst_229 = arith.constant dense<0.000000e+00> : vector<16x32xf32>
    %373 = tpu.matmul %370, %372, %cst_229 {dimension_numbers = #tpu.dot_dimension_numbers<[1], [0], [0], [1], [0, 0, 1, 1], [], []>} : vector<16x32xf32>, vector<32x32xf32>, vector<16x32xf32> -> vector<16x32xf32>
    %c1_230 = arith.constant 1 : index
    %c0_231 = arith.constant 0 : index
    %c0_232 = arith.constant 0 : index
    %374 = vector.load %arg8[%c1_230, %c0_231, %c0_232] : memref<2x1x32xf32, #tpu.memory_space<vmem>>, vector<1x1x32xf32>
    %375 = vector.shape_cast %374 : vector<1x1x32xf32> to vector<1x32xf32>
    %376 = vector.broadcast %375 : vector<1x32xf32> to vector<16x32xf32>
    %377 = arith.addf %373, %376 : vector<16x32xf32>
    %378 = arith.addf %239, %377 : vector<16x32xf32>
    %c1_233 = arith.constant 1 : index
    %c0_234 = arith.constant 0 : index
    %c0_235 = arith.constant 0 : index
    %379 = vector.load %arg9[%c1_233, %c0_234, %c0_235] : memref<2x1x32xf32, #tpu.memory_space<vmem>>, vector<1x1x32xf32>
    %380 = vector.shape_cast %379 : vector<1x1x32xf32> to vector<1x32xf32>
    %c1_236 = arith.constant 1 : index
    %c0_237 = arith.constant 0 : index
    %c0_238 = arith.constant 0 : index
    %381 = vector.load %arg10[%c1_236, %c0_237, %c0_238] : memref<2x1x32xf32, #tpu.memory_space<vmem>>, vector<1x1x32xf32>
    %382 = vector.shape_cast %381 : vector<1x1x32xf32> to vector<1x32xf32>
    %cst_239 = arith.constant dense<0.000000e+00> : vector<16xf32>
    %383 = vector.multi_reduction <add>, %378, %cst_239 [1] : vector<16x32xf32> to vector<16xf32>
    %384 = vector.shape_cast %383 : vector<16xf32> to vector<16x1xf32>
    %cst_240 = arith.constant 3.200000e+01 : f32
    %385 = vector.broadcast %cst_240 : f32 to vector<16x1xf32>
    %386 = arith.divf %384, %385 : vector<16x1xf32>
    %387 = vector.broadcast %386 : vector<16x1xf32> to vector<16x32xf32>
    %388 = arith.subf %378, %387 : vector<16x32xf32>
    %389 = arith.mulf %388, %388 : vector<16x32xf32>
    %cst_241 = arith.constant dense<0.000000e+00> : vector<16xf32>
    %390 = vector.multi_reduction <add>, %389, %cst_241 [1] : vector<16x32xf32> to vector<16xf32>
    %391 = vector.shape_cast %390 : vector<16xf32> to vector<16x1xf32>
    %cst_242 = arith.constant 3.200000e+01 : f32
    %392 = vector.broadcast %cst_242 : f32 to vector<16x1xf32>
    %393 = arith.divf %391, %392 : vector<16x1xf32>
    %394 = vector.broadcast %386 : vector<16x1xf32> to vector<16x32xf32>
    %395 = arith.subf %378, %394 : vector<16x32xf32>
    %cst_243 = arith.constant 9.99999974E-6 : f32
    %396 = vector.broadcast %cst_243 : f32 to vector<16x1xf32>
    %397 = arith.addf %393, %396 : vector<16x1xf32>
    %398 = math.rsqrt %397 : vector<16x1xf32>
    %399 = vector.broadcast %398 : vector<16x1xf32> to vector<16x32xf32>
    %400 = arith.mulf %395, %399 : vector<16x32xf32>
    %401 = vector.broadcast %380 : vector<1x32xf32> to vector<16x32xf32>
    %402 = arith.mulf %400, %401 : vector<16x32xf32>
    %403 = vector.broadcast %382 : vector<1x32xf32> to vector<16x32xf32>
    %404 = arith.addf %402, %403 : vector<16x32xf32>
    %c1_244 = arith.constant 1 : index
    %c0_245 = arith.constant 0 : index
    %c0_246 = arith.constant 0 : index
    %405 = vector.load %arg11[%c1_244, %c0_245, %c0_246] : memref<2x32x64xf32, #tpu.memory_space<vmem>>, vector<1x32x64xf32>
    %406 = vector.shape_cast %405 : vector<1x32x64xf32> to vector<32x64xf32>
    %cst_247 = arith.constant dense<0.000000e+00> : vector<16x64xf32>
    %407 = tpu.matmul %404, %406, %cst_247 {dimension_numbers = #tpu.dot_dimension_numbers<[1], [0], [0], [1], [0, 0, 1, 1], [], []>} : vector<16x32xf32>, vector<32x64xf32>, vector<16x64xf32> -> vector<16x64xf32>
    %c1_248 = arith.constant 1 : index
    %c0_249 = arith.constant 0 : index
    %c0_250 = arith.constant 0 : index
    %408 = vector.load %arg12[%c1_248, %c0_249, %c0_250] : memref<2x1x64xf32, #tpu.memory_space<vmem>>, vector<1x1x64xf32>
    %409 = vector.shape_cast %408 : vector<1x1x64xf32> to vector<1x64xf32>
    %410 = vector.broadcast %409 : vector<1x64xf32> to vector<16x64xf32>
    %411 = arith.addf %407, %410 : vector<16x64xf32>
    %cst_251 = arith.constant 0.000000e+00 : f32
    %412 = vector.broadcast %cst_251 : f32 to vector<16x64xf32>
    %413 = arith.maximumf %411, %412 : vector<16x64xf32>
    %c1_252 = arith.constant 1 : index
    %c0_253 = arith.constant 0 : index
    %c0_254 = arith.constant 0 : index
    %414 = vector.load %arg13[%c1_252, %c0_253, %c0_254] : memref<2x64x32xf32, #tpu.memory_space<vmem>>, vector<1x64x32xf32>
    %415 = vector.shape_cast %414 : vector<1x64x32xf32> to vector<64x32xf32>
    %cst_255 = arith.constant dense<0.000000e+00> : vector<16x32xf32>
    %416 = tpu.matmul %413, %415, %cst_255 {dimension_numbers = #tpu.dot_dimension_numbers<[1], [0], [0], [1], [0, 0, 1, 1], [], []>} : vector<16x64xf32>, vector<64x32xf32>, vector<16x32xf32> -> vector<16x32xf32>
    %c1_256 = arith.constant 1 : index
    %c0_257 = arith.constant 0 : index
    %c0_258 = arith.constant 0 : index
    %417 = vector.load %arg14[%c1_256, %c0_257, %c0_258] : memref<2x1x32xf32, #tpu.memory_space<vmem>>, vector<1x1x32xf32>
    %418 = vector.shape_cast %417 : vector<1x1x32xf32> to vector<1x32xf32>
    %419 = vector.broadcast %418 : vector<1x32xf32> to vector<16x32xf32>
    %420 = arith.addf %416, %419 : vector<16x32xf32>
    %421 = arith.addf %404, %420 : vector<16x32xf32>
    %c0_259 = arith.constant 0 : index
    %c0_260 = arith.constant 0 : index
    %422 = vector.load %arg15[%c0_259, %c0_260] : memref<1x32xf32, #tpu.memory_space<vmem>>, vector<1x32xf32>
    %c0_261 = arith.constant 0 : index
    %c0_262 = arith.constant 0 : index
    %423 = vector.load %arg16[%c0_261, %c0_262] : memref<1x32xf32, #tpu.memory_space<vmem>>, vector<1x32xf32>
    %cst_263 = arith.constant dense<0.000000e+00> : vector<16xf32>
    %424 = vector.multi_reduction <add>, %421, %cst_263 [1] : vector<16x32xf32> to vector<16xf32>
    %425 = vector.shape_cast %424 : vector<16xf32> to vector<16x1xf32>
    %cst_264 = arith.constant 3.200000e+01 : f32
    %426 = vector.broadcast %cst_264 : f32 to vector<16x1xf32>
    %427 = arith.divf %425, %426 : vector<16x1xf32>
    %428 = vector.broadcast %427 : vector<16x1xf32> to vector<16x32xf32>
    %429 = arith.subf %421, %428 : vector<16x32xf32>
    %430 = arith.mulf %429, %429 : vector<16x32xf32>
    %cst_265 = arith.constant dense<0.000000e+00> : vector<16xf32>
    %431 = vector.multi_reduction <add>, %430, %cst_265 [1] : vector<16x32xf32> to vector<16xf32>
    %432 = vector.shape_cast %431 : vector<16xf32> to vector<16x1xf32>
    %cst_266 = arith.constant 3.200000e+01 : f32
    %433 = vector.broadcast %cst_266 : f32 to vector<16x1xf32>
    %434 = arith.divf %432, %433 : vector<16x1xf32>
    %435 = vector.broadcast %427 : vector<16x1xf32> to vector<16x32xf32>
    %436 = arith.subf %421, %435 : vector<16x32xf32>
    %cst_267 = arith.constant 9.99999974E-6 : f32
    %437 = vector.broadcast %cst_267 : f32 to vector<16x1xf32>
    %438 = arith.addf %434, %437 : vector<16x1xf32>
    %439 = math.rsqrt %438 : vector<16x1xf32>
    %440 = vector.broadcast %439 : vector<16x1xf32> to vector<16x32xf32>
    %441 = arith.mulf %436, %440 : vector<16x32xf32>
    %442 = vector.broadcast %422 : vector<1x32xf32> to vector<16x32xf32>
    %443 = arith.mulf %441, %442 : vector<16x32xf32>
    %444 = vector.broadcast %423 : vector<1x32xf32> to vector<16x32xf32>
    %445 = arith.addf %443, %444 : vector<16x32xf32>
    %c0_268 = arith.constant 0 : index
    %c0_269 = arith.constant 0 : index
    %446 = vector.load %arg17[%c0_268, %c0_269] : memref<32x2xf32, #tpu.memory_space<vmem>>, vector<32x2xf32>
    %cst_270 = arith.constant dense<0.000000e+00> : vector<16x2xf32>
    %447 = tpu.matmul %445, %446, %cst_270 {dimension_numbers = #tpu.dot_dimension_numbers<[1], [0], [0], [1], [0, 0, 1, 1], [], []>} : vector<16x32xf32>, vector<32x2xf32>, vector<16x2xf32> -> vector<16x2xf32>
    %c0_271 = arith.constant 0 : index
    %c0_272 = arith.constant 0 : index
    %448 = vector.load %arg18[%c0_271, %c0_272] : memref<1x2xf32, #tpu.memory_space<vmem>>, vector<1x2xf32>
    %449 = vector.broadcast %448 : vector<1x2xf32> to vector<16x2xf32>
    %450 = arith.addf %447, %449 : vector<16x2xf32>
    %c0_273 = arith.constant 0 : index
    %c0_274 = arith.constant 0 : index
    %451 = vector.load %arg19[%c0_273, %c0_274] : memref<16x2xf32, #tpu.memory_space<vmem>>, vector<16x2xf32>
    tpu.vector_store %arg19[%c0_273, %c0_274], %450 {strides = array<i32>} : memref<16x2xf32, #tpu.memory_space<vmem>>, vector<16x2xf32>,
    return
  }
}

</mosaic_0001>

<bundles_post_ra>
// kernel: out_layer_forward.1
= control target key start
LH: loop header
LB: loop body
LE: loop exit
PB: predicated region body
PF: predicated region fallthrough
CT: control target
= control target key end

     0   :  { %vm76_vm0 = vcmask 523264   ;;  %vm108_vm1 = vcmask 261120   ;;  %v2096_v17 = vmov 32.0   ;;  %vm207_vm9 = vcmask 785408   ;;  %s2788_s26 = smov 80   ;;  %s2794_s27 = smov 88   ;;  %s2759_s1 = inlined_call_operand.vmem [shape: f32[64,32], index: 1, kind: input, shape index: {}]   ;;  %s2760_s2 = inlined_call_operand.vmem [shape: f32[1,32], index: 2, kind: input, shape index: {}]   ;;  %s2761_s0 = inlined_call_operand.vmem [shape: f32[16,64], index: 0, kind: input, shape index: {}]   ;;  %s2762_s3 = inlined_call_operand.vmem [shape: f32[2,1,32], index: 3, kind: input, shape index: {}]   ;;  %s2763_s4 = inlined_call_operand.vmem [shape: f32[2,1,32], index: 4, kind: input, shape index: {}]   ;;  %s2764_s6 = inlined_call_operand.vmem [shape: f32[2,1,96], index: 6, kind: input, shape index: {}]   ;;  %s2765_s5 = inlined_call_operand.vmem [shape: f32[2,32,96], index: 5, kind: input, shape index: {}]   ;;  %s2766_s7 = inlined_call_operand.vmem [shape: f32[2,32,32], index: 7, kind: input, shape index: {}]   ;;  %s2767_s8 = inlined_call_operand.vmem [shape: f32[2,1,32], index: 8, kind: input, shape index: {}]   ;;  %s2768_s9 = inlined_call_operand.vmem [shape: f32[2,1,32], index: 9, kind: input, shape index: {}]   ;;  %s2769_s10 = inlined_call_operand.vmem [shape: f32[2,1,32], index: 10, kind: input, shape index: {}]   ;;  %s2770_s12 = inlined_call_operand.vmem [shape: f32[2,1,64], index: 12, kind: input, shape index: {}]   ;;  %s2771_s11 = inlined_call_operand.vmem [shape: f32[2,32,64], index: 11, kind: input, shape index: {}]   ;;  %s2772_s13 = inlined_call_operand.vmem [shape: f32[2,64,32], index: 13, kind: input, shape index: {}]   ;;  %s2773_s14 = inlined_call_operand.vmem [shape: f32[2,1,32], index: 14, kind: input, shape index: {}]   ;;  %s2774_s15 = inlined_call_operand.vmem [shape: f32[1,32], index: 15, kind: input, shape index: {}]   ;;  %s2775_s16 = inlined_call_operand.vmem [shape: f32[1,32], index: 16, kind: input, shape index: {}]   ;;  %s2776_s18 = inlined_call_operand.vmem [shape: f32[1,2], index: 18, kind: input, shape index: {}]   ;;  %s2777_s17 = inlined_call_operand.vmem [shape: f32[32,2], index: 17, kind: input, shape index: {}]   ;;  %s2778_s19 = inlined_call_operand.vmem [shape: f32[16,2], index: 19, kind: output, shape index: {}]  }
   0x1   :  { %2801 = sst [smem:[#allocation3_spill]] %s2759_s1  ;;  %2010 = vrcp.f32 %v2096_v17  ;;  %v173_v34 = vld [vmem:[%s2765_s5 + $0x18] sm:$0xff]  ;;  %v172_v35 = vld [vmem:[%s2765_s5 + $0x10] sm:$0xff]  ;;  %v171_v36 = vld [vmem:[%s2765_s5 + $0x8] sm:$0xff]  ;;  %s2100_s28 = smov 48   ;;  %vm214_vm10 = vcmask 64512  }
   0x2   :  { %2802 = sst [smem:[#allocation4_spill]] %s2760_s2  ;;  %196 = vmatpush.msra.mxu1 %v173_v34  ;;  %v170_v37 = vld [vmem:[%s2765_s5] sm:$0xff]  ;;  %s2796_s29 = smov 56   ;;  %vm484_vm11 = vcmask 130048   ;;  %vm486_vm12 = vcmask 195584  }
   0x3   :  { %2803 = sst [smem:[#allocation5_spill]] %s2761_s0  ;;  %v1992_v56 = vld [vmem:[%s2763_s4] ss:$0 sm:$0xff]  ;;  %s2786_s1 = smov 120  }
   0x4   :  { %2804 = sst [smem:[#allocation6_spill]] %s2762_s3  ;;  %197 = vmatpush.msra.mxu1 %v172_v35  ;;  %s2792_s30 = smov 96  }
   0x5   :  { %s2805_s20 = sld [smem:[#allocation3_spill]]  ;;  %s2790_s21 = smov 72  }
   0x6   :  { %s2806_s22 = sld [smem:[#allocation5_spill]]  ;;  %198 = vmatpush.msra.mxu1 %v171_v36  ;;  %s2784_s2 = smov 104  }
   0x7   :  { %s2807_s3 = sld [smem:[#allocation4_spill]]  ;;  %v2011_v18 = vpop.eup %2010  ;;  %s2107_s23 = smov 64  }
   0x8   :  { %v116_v19 = vmul.f32 32.0, %v2011_v18  ;;  %vm120_vm2 = vweird.f32 %v2011_v18  ;;  %199 = vmatpush.msra.mxu1 %v170_v37  ;;  %s2808_s0 = sld [smem:[#allocation6_spill]]  ;;  %s2797_s24 = smov 24  }
   0x9   :  { %s2109_s25 = smov 8  }
   0xa   :  { %v117_v20 = vsub.f32 1.0, %v116_v19 }
   0xb   :  { %v71_v0 = vld [vmem:[%s2805_s20 + $0x38] sm:$0xff]  ;;  %v70_v1 = vld [vmem:[%s2805_s20 + $0x30] sm:$0xff]  ;;  %v69_v2 = vld [vmem:[%s2805_s20 + $0x28] sm:$0xff] }
   0xc   :  { %91 = vmatpush.msra.mxu0 %v71_v0  ;;  %v68_v3 = vld [vmem:[%s2805_s20 + $0x20] sm:$0xff]  ;;  %v67_v4 = vld [vmem:[%s2805_s20 + $0x18] sm:$0xff]  ;;  %v66_v5 = vld [vmem:[%s2805_s20 + $0x10] sm:$0xff]  ;;  %v118_v21 = vmul.f32 %v2011_v18, %v117_v20 }
   0xd   :  { %v65_v6 = vld [vmem:[%s2805_s20 + $0x8] sm:$0xff]  ;;  %v64_v7 = vld [vmem:[%s2805_s20] sm:$0xff]  ;;  %s2782_s20 = smov 112  }
   0xe   :  { %92 = vmatpush.msra.mxu0 %v70_v1  ;;  %v62_v8 = vld [vmem:[%s2806_s22] sm:$0xff]  ;;  %v63_v9 = vld [vmem:[%s2806_s22 + $0x8] sm:$0xff]  ;;  %v119_v22 = vadd.f32 %v2011_v18, %v118_v21  ;;  %s2106_s22 = smov 40  }
   0xf   :  { %v1990_v10 = vld [vmem:[%s2807_s3] ss:$0 sm:$0xff]  ;;  %s2799_s3 = smov 16  }
  0x10   :  { %93 = vmatpush.msra.mxu0 %v69_v2  ;;  %v2248_v23 = vsel %vm120_vm2, %v2011_v18, %v119_v22  ;;  %v1991_v52 = vld [vmem:[%s2808_s0] ss:$0 sm:$0xff] }
  0x11   :  { %v1995_v2 = vld [vmem:[%s2764_s6] ss:$0 sm:$0xff] }
  0x12   :  { %94 = vmatpush.msra.mxu0 %v68_v3 }
  0x14   :  { %95 = vmatpush.msra.mxu0 %v67_v4 }
  0x16   :  { %96 = vmatpush.msra.mxu0 %v66_v5 }
  0x18   :  { %97 = vmatpush.msra.mxu0 %v65_v6 }
  0x1a   :  { %98 = vmatpush.msra.mxu0 %v64_v7 }
  0x1b   :  { %1874 = vmatmul.msk.f32.vlgmr.msra.gmra.mxu0 %vm76_vm0, %v62_v8 }
  0x23   :  { %1875 = vmatmul.msk.f32.gmra.mxu0 %vm76_vm0, %v63_v9 }
  0x98   :  { %v100_v11 = vpop.f32.mrf.mxu0 }
  0x99   :  { %v101_v12 = vadd.f32 %v1990_v10, %v100_v11 }
  0x9b   :  { %v109_v13 = vsel %vm108_vm1, %v101_v12, 0.0 }
  0x9c   :  { %110 = vadd.xlane.f32.xlu0 %v109_v13 }
  0xa0   :  { %v103_v14 = vpop.f32.mrf.mxu0 }
  0xa1   :  { %v104_v15 = vadd.f32 %v1990_v10, %v103_v14 }
  0xa3   :  { %v112_v16 = vsel %vm108_vm1, %v104_v15, 0.0 }
  0xa4   :  { %113 = vadd.xlane.f32.xlu1 %v112_v16 }
 0x10f   :  { %v111_v24 = vpop.xlane.xlu0 %110 }
 0x110   :  { %v122_v25 = vmul.f32 %v2248_v23, %v111_v24 }
 0x112   :  { %v124_v26 = vsub.f32 %v101_v12, %v122_v25 }
 0x114   :  { %v126_v27 = vmul.f32 %v124_v26, %v124_v26 }
 0x116   :  { %v128_v28 = vsel %vm108_vm1, %v126_v27, 0.0 }
 0x117   :  { %v114_v29 = vpop.xlane.xlu1 %113  ;;  %129 = vadd.xlane.f32.xlu0 %v128_v28 }
 0x118   :  { %v123_v30 = vmul.f32 %v2248_v23, %v114_v29 }
 0x11a   :  { %v125_v31 = vsub.f32 %v104_v15, %v123_v30 }
 0x11c   :  { %v127_v32 = vmul.f32 %v125_v31, %v125_v31 }
 0x11e   :  { %v131_v33 = vsel %vm108_vm1, %v127_v32, 0.0 }
 0x11f   :  { %132 = vadd.xlane.f32.xlu1 %v131_v33 }
 0x18a   :  { %v130_v38 = vpop.xlane.xlu0 %129 }
 0x18b   :  { %v134_v39 = vmul.f32 %v130_v38, %v2248_v23 }
 0x18d   :  { %v136_v40 = vadd.f32 1e-05, %v134_v39 }
 0x18f   :  { %2012 = vrsqrt.f32 %v136_v40  ;;  %vm144_vm4 = vweird.f32 %v136_v40 }
 0x192   :  { %v133_v41 = vpop.xlane.xlu1 %132 }
 0x193   :  { %v135_v42 = vmul.f32 %v133_v41, %v2248_v23 }
 0x195   :  { %v2013_v43 = vpop.eup %2012  ;;  %v137_v44 = vadd.f32 1e-05, %v135_v42 }
 0x196   :  { %v139_v45 = vmul.f32 %v2013_v43, %v136_v40  ;;  %vm145_vm3 = vweird.f32 %v2013_v43 }
 0x197   :  { %2014 = vrsqrt.f32 %v137_v44  ;;  %vm146_vm5 = vmor %vm144_vm4, %vm145_vm3  ;;  %vm154_vm6 = vweird.f32 %v137_v44 }
 0x198   :  { %v140_v46 = vmul.f32 %v2013_v43, %v139_v45 }
 0x19a   :  { %v141_v47 = vmul.f32 0.5, %v140_v46 }
 0x19c   :  { %v142_v48 = vsub.f32 1.5, %v141_v47 }
 0x19d   :  { %v2015_v49 = vpop.eup %2014 }
 0x19e   :  { %v143_v50 = vmul.f32 %v2013_v43, %v142_v48  ;;  %v149_v51 = vmul.f32 %v2015_v49, %v137_v44  ;;  %vm155_vm7 = vweird.f32 %v2015_v49 }
 0x19f   :  { %vm156_vm8 = vmor %vm154_vm6, %vm155_vm7 }
 0x1a0   :  { %v147_v53 = vsel %vm146_vm5, %v2013_v43, %v143_v50  ;;  %v150_v54 = vmul.f32 %v2015_v49, %v149_v51 }
 0x1a1   :  { %v158_v55 = vmul.f32 %v147_v53, %v124_v26 }
 0x1a2   :  { %v151_v57 = vmul.f32 0.5, %v150_v54 }
 0x1a3   :  { %v163_v58 = vmul.f32 %v1991_v52, %v158_v55 }
 0x1a4   :  { %v152_v59 = vsub.f32 1.5, %v151_v57 }
 0x1a5   :  { %v2274_v60 = vadd.f32 %v1992_v56, %v163_v58 }
 0x1a6   :  { %v153_v61 = vmul.f32 %v2015_v49, %v152_v59 }
 0x1a7   :  { %1876 = vmatmul.msk.f32.vlgmr.msra.gmra.mxu1 %vm108_vm1, %v2274_v60 }
 0x1a8   :  { %v157_v62 = vsel %vm156_vm8, %v2015_v49, %v153_v61 }
 0x1a9   :  { %v159_v63 = vmul.f32 %v157_v62, %v125_v31 }
 0x1ab   :  { %v164_v0 = vmul.f32 %v1991_v52, %v159_v63 }
 0x1ad   :  { %v2278_v1 = vadd.f32 %v1992_v56, %v164_v0 }
 0x1af   :  { %1877 = vmatmul.msk.f32.gmra.mxu1 %vm108_vm1, %v2278_v1 }
 0x224   :  { %v201_v3 = vpop.f32.mrf.mxu1 }
 0x225   :  { %v202_v4 = vadd.f32 %v1995_v2, %v201_v3 }
 0x227   :  { %208 = vst.msk [vmem:[#allocation2] sm:$0xff] %vm207_vm9, %v202_v4 }
 0x22c   :  { %v204_v5 = vpop.f32.mrf.mxu1 }
 0x22d   :  { %v205_v6 = vadd.f32 %v1995_v2, %v204_v5 }
 0x22e   :  { %v2286_v7 = vld [vmem:[#allocation2] sm:$0xff] }
 0x22f   :  { %209 = vst.msk [vmem:[#allocation2 + $0x8] sm:$0xff] %vm207_vm9, %v205_v6  ;;  %341 = vrot.lane.b32.xlu1 %v2286_v7, %s2782_s20  ;;  %343 = vrot.lane.b32.xlu0 %v2286_v7, %s2788_s26 }
 0x230   :  { %278 = vrot.lane.b32.xlu2 %v2286_v7, %s2794_s27 }
 0x236   :  { %v2301_v8 = vld [vmem:[#allocation2 + $0x8] sm:$0xff] }
 0x237   :  { %380 = vrot.lane.b32.xlu1 %v2286_v7, %s2100_s28  ;;  %315 = vrot.lane.b32.xlu0 %v2286_v7, %s2796_s29 }
 0x238   :  { %276 = vrot.lane.b32.xlu2 %v2286_v7, %s2786_s1 }
 0x23f   :  { %490 = vrot.lane.b32.xlu0 %v2301_v8, %s2792_s30 }
 0x240   :  { %408 = vrot.lane.b32.xlu2 %v2286_v7, %s2790_s21 }
 0x248   :  { %406 = vrot.lane.b32.xlu2 %v2286_v7, %s2784_s2 }
 0x250   :  { %212 = vrot.lane.b32.xlu2 %v2286_v7, %s2792_s30 }
 0x258   :  { %445 = vrot.lane.b32.xlu2 %v2286_v7, %s2106_s22 }
 0x28a   :  { %v279_v9 = vpop.permute.xlu2 %278 }
 0x28b   :  { %1881 = vmatpush.xpose.msk.msra.mxu3 %vm214_vm10, %v279_v9 }
 0x292   :  { %v277_v10 = vpop.permute.xlu2 %276 }
 0x293   :  { %1882 = vmatmul.msk.f32.vlgmr.msra.gmra.mxu3 %vm214_vm10, %v277_v10 }
 0x29a   :  { %v409_v11 = vpop.permute.xlu2 %408 }
 0x29b   :  { %1887 = vmatpush.xpose.msk.msrb.mxu1 %vm214_vm10, %v409_v11 }
 0x2a1   :  { %v344_v12 = vpop.permute.xlu0 %343  ;;  %v342_v14 = vpop.permute.xlu1 %341 }
 0x2a2   :  { %v407_v13 = vpop.permute.xlu2 %406  ;;  %1884 = vmatpush.xpose.msk.msrb.mxu3 %vm214_vm10, %v344_v12 }
 0x2a3   :  { %1888 = vmatmul.msk.f32.vlgmr.msrb.gmra.mxu1 %vm214_vm10, %v407_v13 }
 0x2a5   :  { %1885 = vmatmul.msk.f32.vlgmr.msrb.gmra.mxu3 %vm214_vm10, %v342_v14 }
 0x2a9   :  { %v316_v15 = vpop.permute.xlu0 %315  ;;  %v381_v17 = vpop.permute.xlu1 %380 }
 0x2aa   :  { %v213_v16 = vpop.permute.xlu2 %212 }
 0x2ab   :  { %1878 = vmatpush.xpose.msk.msra.mxu2 %vm214_vm10, %v213_v16 }
 0x2ae   :  { %1879 = vmatmul.msk.f32.vlgmr.msra.gmra.mxu2 %vm214_vm10, %v2286_v7 }
 0x2af   :  { %336 = vmatpush.msrb.mxu2 %v316_v15 }
 0x2b1   :  { %401 = vmatpush.msra.mxu2 %v381_v17  ;;  %v491_v28 = vpop.permute.xlu0 %490 }
 0x2b2   :  { %v446_v18 = vpop.permute.xlu2 %445 }
 0x2b3   :  { %466 = vmatpush.msra.mxu3 %v446_v18 }
 0x316   :  { %v301_v19 = vpop.f32.mrf.mxu3 }
 0x317   :  { %v304_v20 = vsel %vm214_vm10, %v301_v19, -inf }
 0x318   :  { %305 = vmax.xlane.f32.xlu0 %v304_v20 }
 0x320   :  { %v431_v21 = vpop.f32.mrf.mxu1 }
 0x321   :  { %v434_v22 = vsel %vm214_vm10, %v431_v21, -inf }
 0x322   :  { %435 = vmax.xlane.f32.xlu1 %v434_v22 }
 0x328   :  { %v366_v26 = vpop.f32.mrf.mxu3 }
 0x329   :  { %v369_v27 = vsel %vm214_vm10, %v366_v26, -inf }
 0x32c   :  { %555 = vrot.lane.b32.xlu0 %v2301_v8, %s2794_s27  ;;  %s2815_s27 = smov 112  }
 0x331   :  { %v236_v24 = vpop.f32.mrf.mxu2 }
 0x332   :  { %v239_v25 = vsel %vm214_vm10, %v236_v24, -inf }
 0x333   :  { %240 = vmax.xlane.f32.xlu2 %v239_v25  ;;  %v765_v25 = vld [vmem:[%s2766_s7 + $0x10] sm:$0xff] }
 0x33b   :  { %553 = vrot.lane.b32.xlu1 %v2301_v8, %s2786_s1  ;;  %370 = vmax.xlane.f32.xlu2 %v369_v27  ;;  %v763_v27 = vld [vmem:[%s2766_s7] sm:$0xff] }
 0x353   :  { %620 = vrot.lane.b32.xlu2 %v2301_v8, %s2788_s26  ;;  %s2814_s26 = smov 104  }
 0x38b   :  { %v306_v29 = vpop.xlane.xlu0 %305 }
 0x38c   :  { %v307_v30 = vsub.f32 %v301_v19, %v306_v29 }
 0x38e   :  { %v308_v31 = vmul.f32 1.442695, %v307_v30 }
 0x390   :  { %2016 = vpow2.f32 %v308_v31 }
 0x395   :  { %v436_v32 = vpop.xlane.xlu1 %435 }
 0x396   :  { %v2017_v33 = vpop.eup %2016  ;;  %v437_v34 = vsub.f32 %v431_v21, %v436_v32 }
 0x397   :  { %v310_v35 = vsel %vm214_vm10, %v2017_v33, 0.0 }
 0x398   :  { %v438_v36 = vmul.f32 1.442695, %v437_v34  ;;  %311 = vadd.xlane.f32.xlu0 %v310_v35 }
 0x39a   :  { %2018 = vpow2.f32 %v438_v36 }
 0x39e   :  { %v556_v37 = vpop.permute.xlu0 %555 }
 0x39f   :  { %1893 = vmatpush.xpose.msk.msra.mxu1 %vm214_vm10, %v556_v37 }
 0x3a0   :  { %v2019_v38 = vpop.eup %2018 }
 0x3a1   :  { %v440_v39 = vsel %vm214_vm10, %v2019_v38, 0.0 }
 0x3a2   :  { %441 = vadd.xlane.f32.xlu2 %v440_v39 }
 0x3a6   :  { %v241_v40 = vpop.xlane.xlu2 %240 }
 0x3a7   :  { %v242_v47 = vsub.f32 %v236_v24, %v241_v40  ;;  %v766_v24 = vld [vmem:[%s2766_s7 + $0x18] sm:$0xff] }
 0x3a9   :  { %v243_v48 = vmul.f32 1.442695, %v242_v47 }
 0x3ac   :  { %685 = vrot.lane.b32.xlu0 %v2301_v8, %s2790_s21 }
 0x3ad   :  { %v554_v41 = vpop.permute.xlu1 %553 }
 0x3ae   :  { %1894 = vmatmul.msk.f32.vlgmr.msra.gmra.mxu1 %vm214_vm10, %v554_v41  ;;  %v371_v42 = vpop.xlane.xlu2 %370 }
 0x3af   :  { %v372_v43 = vsub.f32 %v366_v26, %v371_v42  ;;  %v764_v26 = vld [vmem:[%s2766_s7 + $0x8] sm:$0xff] }
 0x3b1   :  { %v373_v44 = vmul.f32 1.442695, %v372_v43 }
 0x3b3   :  { %2020 = vpow2.f32 %v373_v44 }
 0x3b4   :  { %2022 = vpow2.f32 %v243_v48 }
 0x3b6   :  { %v621_v52 = vpop.permute.xlu2 %620 }
 0x3b9   :  { %v2021_v45 = vpop.eup %2020 }
 0x3ba   :  { %683 = vrot.lane.b32.xlu2 %v2301_v8, %s2784_s2  ;;  %v375_v46 = vsel %vm214_vm10, %v2021_v45, 0.0  ;;  %v2023_v49 = vpop.eup %2022 }
 0x3bb   :  { %376 = vadd.xlane.f32.xlu1 %v375_v46  ;;  %v245_v50 = vsel %vm214_vm10, %v2023_v49, 0.0 }
 0x3d4   :  { %618 = vrot.lane.b32.xlu1 %v2301_v8, %s2782_s20  ;;  %s2813_s20 = smov 120  }
 0x3d6   :  { %246 = vadd.xlane.f32.xlu0 %v245_v50 }
 0x3dc   :  { %250 = vrot.lane.b32.xlu1 %v2286_v7, %s2107_s23 }
 0x40b   :  { %v312_v51 = vpop.xlane.xlu0 %311 }
 0x40c   :  { %2024 = vrcp.f32 %v312_v51 }
 0x412   :  { %v2025_v53 = vpop.eup %2024 }
 0x413   :  { %v314_v54 = vmul.f32 %v2025_v53, %v2017_v33 }
 0x415   :  { %1883 = vmatmul.msk.f32.vlgmr.msrb.gmra.mxu2 %vm214_vm10, %v314_v54  ;;  %v442_v55 = vpop.xlane.xlu2 %441 }
 0x416   :  { %1890 = vmatpush.xpose.msk.msrb.mxu2 %vm214_vm10, %v491_v28  ;;  %2026 = vrcp.f32 %v442_v55  ;;  %v2396_v55 = vld [vmem:[%s2767_s8] ss:$0 sm:$0xff] }
 0x41c   :  { %v2027_v56 = vpop.eup %2026 }
 0x41d   :  { %v444_v57 = vmul.f32 %v2027_v56, %v2019_v38  ;;  %v684_v59 = vpop.permute.xlu2 %683 }
 0x41e   :  { %v686_v58 = vpop.permute.xlu0 %685 }
 0x41f   :  { %1889 = vmatmul.msk.f32.vlgmr.msra.gmra.mxu3 %vm214_vm10, %v444_v57  ;;  %1899 = vmatpush.xpose.msk.msrb.mxu1 %vm214_vm10, %v686_v58 }
 0x422   :  { %1900 = vmatmul.msk.f32.vlgmr.msrb.gmra.mxu1 %vm214_vm10, %v684_v59 }
 0x42b   :  { %v578_v61 = vpop.f32.mrf.mxu1 }
 0x42c   :  { %v581_v62 = vsel %vm214_vm10, %v578_v61, -inf }
 0x42d   :  { %582 = vmax.xlane.f32.xlu1 %v581_v62 }
 0x42e   :  { %v377_v63 = vpop.xlane.xlu1 %376 }
 0x42f   :  { %2028 = vrcp.f32 %v377_v63 }
 0x435   :  { %v2029_v0 = vpop.eup %2028 }
 0x436   :  { %v379_v2 = vmul.f32 %v2029_v0, %v2021_v45 }
 0x438   :  { %1886 = vmatmul.msk.f32.vlgmr.msra.gmra.mxu2 %vm214_vm10, %v379_v2 }
 0x439   :  { %1896 = vmatpush.xpose.msk.msra.mxu2 %vm214_vm10, %v621_v52 }
 0x440   :  { %1891 = vmatmul.msk.f32.vlgmr.msrb.gmra.mxu2 %vm214_vm10, %v2301_v8 }
 0x441   :  { %789 = vmatpush.msrb.mxu2 %v766_v24 }
 0x443   :  { %790 = vmatpush.msrb.mxu2 %v765_v25 }
 0x445   :  { %791 = vmatpush.msrb.mxu2 %v764_v26 }
 0x446   :  { %v619_v3 = vpop.permute.xlu1 %618 }
 0x447   :  { %792 = vmatpush.msrb.mxu2 %v763_v27 }
 0x448   :  { %1897 = vmatmul.msk.f32.vlgmr.msra.gmra.mxu2 %vm214_vm10, %v619_v3 }
 0x449   :  { %v247_v4 = vpop.xlane.xlu0 %246 }
 0x44a   :  { %2030 = vrcp.f32 %v247_v4 }
 0x44e   :  { %v251_v5 = vpop.permute.xlu1 %250 }
 0x44f   :  { %271 = vmatpush.msrb.mxu0 %v251_v5 }
 0x450   :  { %v2031_v6 = vpop.eup %2030 }
 0x451   :  { %v249_v7 = vmul.f32 %v2031_v6, %v2023_v49 }
 0x453   :  { %1880 = vmatmul.msk.f32.vlgmr.msrb.gmra.mxu0 %vm214_vm10, %v249_v7 }
 0x498   :  { %v338_v15 = vpop.f32.mrf.mxu2 }
 0x49f   :  { %v708_v9 = vpop.f32.mrf.mxu1 }
 0x4a0   :  { %v583_v10 = vpop.xlane.xlu1 %582  ;;  %v711_v11 = vsel %vm214_vm10, %v708_v9, -inf }
 0x4a1   :  { %v584_v12 = vsub.f32 %v578_v61, %v583_v10  ;;  %712 = vmax.xlane.f32.xlu0 %v711_v11 }
 0x4a2   :  { %v468_v13 = vpop.f32.mrf.mxu3 }
 0x4a3   :  { %v585_v14 = vmul.f32 1.442695, %v584_v12  ;;  %480 = vrot.lane.b32.xlu2 %v468_v13, %s2797_s24 }
 0x4a5   :  { %2032 = vpow2.f32 %v585_v14 }
 0x4ab   :  { %v2033_v16 = vpop.eup %2032  ;;  %472 = vrot.lane.b32.xlu2 %v338_v15, %s2109_s25 }
 0x4ac   :  { %v587_v17 = vsel %vm214_vm10, %v2033_v16, 0.0 }
 0x4ad   :  { %588 = vadd.xlane.f32.xlu1 %v587_v17  ;;  %v861_v17 = vld [vmem:[%s2771_s11 + $0x18] sm:$0xff] }
 0x4bb   :  { %v403_v18 = vpop.f32.mrf.mxu2 }
 0x4bc   :  { %476 = vrot.lane.b32.xlu2 %v403_v18, %s2799_s3  ;;  %v860_v18 = vld [vmem:[%s2771_s11 + $0x10] sm:$0xff] }
 0x4c3   :  { %v513_v19 = vpop.f32.mrf.mxu2 }
 0x4c4   :  { %v516_v22 = vsel %vm214_vm10, %v513_v19, -inf }
 0x4cb   :  { %v643_v20 = vpop.f32.mrf.mxu2 }
 0x4cc   :  { %v646_v21 = vsel %vm214_vm10, %v643_v20, -inf }
 0x4cd   :  { %647 = vmax.xlane.f32.xlu0 %v646_v21 }
 0x4d0   :  { %v273_v31 = vpop.f32.mrf.mxu0 }
 0x4e1   :  { %592 = vrot.lane.b32.xlu0 %v2301_v8, %s2796_s29  ;;  %s2816_s29 = smov 56  }
 0x4e5   :  { %517 = vmax.xlane.f32.xlu2 %v516_v22 }
 0x4fd   :  { %527 = vrot.lane.b32.xlu2 %v2301_v8, %s2107_s23  ;;  %v481_v28 = vpop.permute.xlu2 %480 }
 0x505   :  { %v473_v29 = vpop.permute.xlu2 %472 }
 0x506   :  { %v483_v33 = vsel %vm214_vm10, %v273_v31, %v473_v29  ;;  %v2425_v31 = vld [vmem:[%s2768_s9] ss:$0 sm:$0xff] }
 0x514   :  { %v713_v30 = vpop.xlane.xlu0 %712 }
 0x515   :  { %v714_v32 = vsub.f32 %v708_v9, %v713_v30 }
 0x516   :  { %v477_v34 = vpop.permute.xlu2 %476 }
 0x517   :  { %v715_v35 = vmul.f32 1.442695, %v714_v32  ;;  %v485_v36 = vsel %vm484_vm11, %v483_v33, %v477_v34  ;;  %v2430_v34 = vld [vmem:[%s2769_s10] ss:$0 sm:$0xff] }
 0x518   :  { %v487_v37 = vsel %vm486_vm12, %v485_v36, %v481_v28 }
 0x519   :  { %2034 = vpow2.f32 %v715_v35  ;;  %1902 = vmatmul.msk.f32.vlgmr.msrb.gmra.mxu2 %vm108_vm1, %v487_v37  ;;  %v904_v37 = vld [vmem:[%s2772_s13 + $0x38] sm:$0xff] }
 0x51a   :  { %923 = vmatpush.msra.mxu1 %v904_v37  ;;  %v2504_v37 = vld [vmem:[%s2808_s0 + $0x1] ss:$0 sm:$0xff] }
 0x51f   :  { %v2035_v38 = vpop.eup %2034 }
 0x520   :  { %v717_v39 = vsel %vm214_vm10, %v2035_v38, 0.0  ;;  %v589_v43 = vpop.xlane.xlu1 %588 }
 0x521   :  { %718 = vadd.xlane.f32.xlu1 %v717_v39  ;;  %v902_v39 = vld [vmem:[%s2772_s13 + $0x28] sm:$0xff] }
 0x540   :  { %v648_v40 = vpop.xlane.xlu0 %647 }
 0x541   :  { %v649_v41 = vsub.f32 %v643_v20, %v648_v40  ;;  %v858_v20 = vld [vmem:[%s2771_s11] sm:$0xff] }
 0x542   :  { %v901_v40 = vld [vmem:[%s2772_s13 + $0x20] sm:$0xff] }
 0x543   :  { %v650_v42 = vmul.f32 1.442695, %v649_v41  ;;  %v900_v41 = vld [vmem:[%s2772_s13 + $0x18] sm:$0xff] }
 0x545   :  { %2036 = vpow2.f32 %v650_v42 }
 0x546   :  { %2038 = vrcp.f32 %v589_v43 }
 0x54b   :  { %v2037_v44 = vpop.eup %2036 }
 0x54c   :  { %v652_v45 = vsel %vm214_vm10, %v2037_v44, 0.0  ;;  %v2039_v46 = vpop.eup %2038 }
 0x54d   :  { %653 = vadd.xlane.f32.xlu1 %v652_v45  ;;  %v591_v47 = vmul.f32 %v2039_v46, %v2033_v16 }
 0x553   :  { %v593_v48 = vpop.permute.xlu0 %592 }
 0x554   :  { %613 = vmatpush.msrb.mxu3 %v593_v48  ;;  %v899_v48 = vld [vmem:[%s2772_s13 + $0x10] sm:$0xff] }
 0x555   :  { %1895 = vmatmul.msk.f32.vlgmr.msrb.gmra.mxu3 %vm214_vm10, %v591_v47 }
 0x558   :  { %v518_v49 = vpop.xlane.xlu2 %517 }
 0x559   :  { %v519_v50 = vsub.f32 %v513_v19, %v518_v49  ;;  %v859_v19 = vld [vmem:[%s2771_s11 + $0x8] sm:$0xff] }
 0x55a   :  { %v898_v49 = vld [vmem:[%s2772_s13 + $0x8] sm:$0xff] }
 0x55b   :  { %v520_v51 = vmul.f32 1.442695, %v519_v50  ;;  %v897_v50 = vld [vmem:[%s2772_s13] sm:$0xff] }
 0x55d   :  { %2040 = vpow2.f32 %v520_v51  ;;  %v2466_v51 = vld [vmem:[%s2770_s12] ss:$0 sm:$0xff] }
 0x560   :  { %v528_v52 = vpop.permute.xlu2 %527 }
 0x561   :  { %548 = vmatpush.msra.mxu0 %v528_v52 }
 0x563   :  { %v2041_v53 = vpop.eup %2040 }
 0x564   :  { %v522_v54 = vsel %vm214_vm10, %v2041_v53, 0.0 }
 0x565   :  { %523 = vadd.xlane.f32.xlu0 %v522_v54 }
 0x566   :  { %722 = vrot.lane.b32.xlu1 %v2301_v8, %s2106_s22 }
 0x579   :  { %657 = vrot.lane.b32.xlu0 %v2301_v8, %s2100_s28 }
 0x594   :  { %v719_v61 = vpop.xlane.xlu1 %718 }
 0x595   :  { %2042 = vrcp.f32 %v719_v61  ;;  %v2476_v61 = vld [vmem:[%s2773_s14] ss:$0 sm:$0xff] }
 0x59b   :  { %v2043_v63 = vpop.eup %2042 }
 0x59c   :  { %v794_v56 = vpop.f32.mrf.mxu2  ;;  %v721_v0 = vmul.f32 %v2043_v63, %v2035_v38  ;;  %v903_v38 = vld [vmem:[%s2772_s13 + $0x30] sm:$0xff] }
 0x59d   :  { %v795_v57 = vadd.f32 %v2396_v55, %v794_v56  ;;  %924 = vmatpush.msra.mxu1 %v903_v38 }
 0x59f   :  { %v800_v58 = vadd.f32 %v795_v57, %v2274_v60  ;;  %925 = vmatpush.msra.mxu1 %v902_v39  ;;  %v1994_v39 = vld [vmem:[%s2763_s4 + $0x1] ss:$0 sm:$0xff]  ;;  %s2809_s4 = smov 88  }
 0x5a1   :  { %v804_v59 = vsel %vm108_vm1, %v800_v58, 0.0  ;;  %926 = vmatpush.msra.mxu1 %v901_v40 }
 0x5a3   :  { %805 = vadd.xlane.f32.xlu0 %v804_v59  ;;  %927 = vmatpush.msra.mxu1 %v900_v41 }
 0x5a5   :  { %928 = vmatpush.msra.mxu1 %v899_v48 }
 0x5a7   :  { %929 = vmatpush.msra.mxu1 %v898_v49 }
 0x5a9   :  { %930 = vmatpush.msra.mxu1 %v897_v50 }
 0x5c0   :  { %v654_v62 = vpop.xlane.xlu1 %653 }
 0x5d8   :  { %v723_v2 = vpop.permute.xlu1 %722  ;;  %v615_v8 = vpop.f32.mrf.mxu3 }
 0x5d9   :  { %v524_v3 = vpop.xlane.xlu0 %523  ;;  %743 = vmatpush.msra.mxu3 %v723_v2  ;;  %749 = vrot.lane.b32.xlu1 %v615_v8, %s2109_s25 }
 0x5da   :  { %2044 = vrcp.f32 %v524_v3  ;;  %1901 = vmatmul.msk.f32.vlgmr.msra.gmra.mxu3 %vm214_vm10, %v721_v0 }
 0x5db   :  { %2046 = vrcp.f32 %v654_v62 }
 0x5e0   :  { %v2045_v4 = vpop.eup %2044 }
 0x5e1   :  { %v526_v5 = vmul.f32 %v2045_v4, %v2041_v53  ;;  %v2047_v60 = vpop.eup %2046 }
 0x5e2   :  { %v656_v6 = vmul.f32 %v2047_v60, %v2037_v44 }
 0x5e3   :  { %1892 = vmatmul.msk.f32.vlgmr.msra.gmra.mxu0 %vm214_vm10, %v526_v5 }
 0x5eb   :  { %v658_v7 = vpop.permute.xlu0 %657 }
 0x5ec   :  { %678 = vmatpush.msrb.mxu0 %v658_v7 }
 0x5ed   :  { %1898 = vmatmul.msk.f32.vlgmr.msrb.gmra.mxu0 %vm214_vm10, %v656_v6 }
 0x5ee   :  { %884 = vmatpush.msra.mxu0 %v861_v17 }
 0x5f0   :  { %885 = vmatpush.msra.mxu0 %v860_v18 }
 0x5f2   :  { %886 = vmatpush.msra.mxu0 %v859_v19 }
 0x5f4   :  { %887 = vmatpush.msra.mxu0 %v858_v20 }
 0x616   :  { %v806_v9 = vpop.xlane.xlu0 %805 }
 0x617   :  { %v810_v10 = vmul.f32 %v806_v9, %v2248_v23 }
 0x619   :  { %v812_v11 = vsub.f32 %v800_v58, %v810_v10 }
 0x61b   :  { %v814_v12 = vmul.f32 %v812_v11, %v812_v11 }
 0x61d   :  { %v816_v13 = vsel %vm108_vm1, %v814_v12, 0.0 }
 0x61e   :  { %817 = vadd.xlane.f32.xlu2 %v816_v13 }
 0x64b   :  { %v750_v42 = vpop.permute.xlu1 %749 }
 0x65d   :  { %v745_v16 = vpop.f32.mrf.mxu3 }
 0x660   :  { %v550_v14 = vpop.f32.mrf.mxu0 }
 0x661   :  { %v760_v44 = vsel %vm214_vm10, %v550_v14, %v750_v42 }
 0x66a   :  { %v680_v15 = vpop.f32.mrf.mxu0 }
 0x66b   :  { %753 = vrot.lane.b32.xlu1 %v680_v15, %s2799_s3  ;;  %s2811_s3 = smov 72  }
 0x673   :  { %757 = vrot.lane.b32.xlu1 %v745_v16, %s2797_s24  ;;  %s2810_s24 = smov 96  }
 0x691   :  { %v818_v21 = vpop.xlane.xlu2 %817 }
 0x692   :  { %v822_v22 = vmul.f32 %v818_v21, %v2248_v23 }
 0x694   :  { %v824_v24 = vadd.f32 1e-05, %v822_v22 }
 0x696   :  { %2048 = vrsqrt.f32 %v824_v24  ;;  %vm832_vm14 = vweird.f32 %v824_v24 }
 0x69c   :  { %v2049_v25 = vpop.eup %2048 }
 0x69d   :  { %v827_v26 = vmul.f32 %v2049_v25, %v824_v24  ;;  %vm833_vm13 = vweird.f32 %v2049_v25  ;;  %v1913_v24 = vld [vmem:[%s2765_s5 + $0x38] sm:$0xff] }
 0x69e   :  { %vm834_vm15 = vmor %vm832_vm14, %vm833_vm13  ;;  %1026 = vmatpush.msrb.mxu3 %v1913_v24 }
 0x69f   :  { %v828_v27 = vmul.f32 %v2049_v25, %v827_v26  ;;  %v1911_v26 = vld [vmem:[%s2765_s5 + $0x28] sm:$0xff] }
 0x6a1   :  { %v829_v28 = vmul.f32 0.5, %v828_v27  ;;  %v1910_v27 = vld [vmem:[%s2765_s5 + $0x20] sm:$0xff] }
 0x6a3   :  { %v830_v29 = vsub.f32 1.5, %v829_v28 }
 0x6a5   :  { %v831_v30 = vmul.f32 %v2049_v25, %v830_v29 }
 0x6a7   :  { %v835_v32 = vsel %vm834_vm15, %v2049_v25, %v831_v30  ;;  %v1912_v25 = vld [vmem:[%s2765_s5 + $0x30] sm:$0xff] }
 0x6a8   :  { %v846_v33 = vmul.f32 %v835_v32, %v812_v11  ;;  %1027 = vmatpush.msrb.mxu3 %v1912_v25 }
 0x6aa   :  { %v851_v35 = vmul.f32 %v2425_v31, %v846_v33  ;;  %1028 = vmatpush.msrb.mxu3 %v1911_v26 }
 0x6ac   :  { %v856_v36 = vadd.f32 %v2430_v34, %v851_v35  ;;  %1029 = vmatpush.msrb.mxu3 %v1910_v27 }
 0x6ae   :  { %1904 = vmatmul.msk.f32.vlgmr.msra.gmra.mxu0 %vm108_vm1, %v856_v36 }
 0x6dd   :  { %v754_v43 = vpop.permute.xlu1 %753 }
 0x6de   :  { %v761_v45 = vsel %vm484_vm11, %v760_v44, %v754_v43 }
 0x6e5   :  { %v758_v46 = vpop.permute.xlu1 %757 }
 0x6e6   :  { %v762_v47 = vsel %vm486_vm12, %v761_v45, %v758_v46  ;;  %v2519_v46 = vld [vmem:[%s2764_s6 + $0x1] ss:$0 sm:$0xff]  ;;  %s2812_s6 = smov 80  }
 0x6e7   :  { %1903 = vmatmul.msk.f32.gmra.mxu2 %vm108_vm1, %v762_v47 }
 0x72b   :  { %v889_v52 = vpop.f32.mrf.mxu0 }
 0x72c   :  { %v890_v53 = vadd.f32 %v2466_v51, %v889_v52 }
 0x72e   :  { %v895_v54 = vmax.f32 %v890_v53, 0.0 }
 0x730   :  { %1906 = vmatmul.msk.f32.vlgmr.msra.gmra.mxu1 %vm76_vm0, %v895_v54 }
 0x76a   :  { %v797_v56 = vpop.f32.mrf.mxu2 }
 0x76b   :  { %v798_v57 = vadd.f32 %v2396_v55, %v797_v56 }
 0x76d   :  { %v801_v58 = vadd.f32 %v798_v57, %v2278_v1 }
 0x76f   :  { %v807_v59 = vsel %vm108_vm1, %v801_v58, 0.0 }
 0x770   :  { %808 = vadd.xlane.f32.xlu1 %v807_v59 }
 0x7ad   :  { %v932_v62 = vpop.f32.mrf.mxu1 }
 0x7ae   :  { %v933_v63 = vadd.f32 %v2476_v61, %v932_v62 }
 0x7b0   :  { %v938_v0 = vadd.f32 %v933_v63, %v856_v36 }
 0x7b2   :  { %v944_v2 = vsel %vm108_vm1, %v938_v0, 0.0 }
 0x7b3   :  { %945 = vadd.xlane.f32.xlu2 %v944_v2 }
 0x7e3   :  { %v809_v8 = vpop.xlane.xlu1 %808 }
 0x7e4   :  { %v811_v55 = vmul.f32 %v809_v8, %v2248_v23 }
 0x7e6   :  { %v813_v3 = vsub.f32 %v801_v58, %v811_v55 }
 0x7e8   :  { %v815_v1 = vmul.f32 %v813_v3, %v813_v3 }
 0x7ea   :  { %v819_v4 = vsel %vm108_vm1, %v815_v1, 0.0 }
 0x7eb   :  { %820 = vadd.xlane.f32.xlu0 %v819_v4 }
 0x826   :  { %v946_v5 = vpop.xlane.xlu2 %945 }
 0x827   :  { %v950_v60 = vmul.f32 %v946_v5, %v2248_v23 }
 0x829   :  { %v952_v6 = vsub.f32 %v938_v0, %v950_v60 }
 0x82b   :  { %v954_v7 = vmul.f32 %v952_v6, %v952_v6 }
 0x82d   :  { %v956_v9 = vsel %vm108_vm1, %v954_v7, 0.0 }
 0x82e   :  { %957 = vadd.xlane.f32.xlu0 %v956_v9 }
 0x85e   :  { %v821_v10 = vpop.xlane.xlu0 %820 }
 0x85f   :  { %v823_v11 = vmul.f32 %v821_v10, %v2248_v23 }
 0x861   :  { %v825_v12 = vadd.f32 1e-05, %v823_v11 }
 0x863   :  { %2050 = vrsqrt.f32 %v825_v12  ;;  %vm842_vm3 = vweird.f32 %v825_v12 }
 0x869   :  { %v2051_v13 = vpop.eup %2050 }
 0x86a   :  { %v837_v14 = vmul.f32 %v2051_v13, %v825_v12  ;;  %vm843_vm2 = vweird.f32 %v2051_v13 }
 0x86b   :  { %vm844_vm4 = vmor %vm842_vm3, %vm843_vm2 }
 0x86c   :  { %v838_v15 = vmul.f32 %v2051_v13, %v837_v14 }
 0x86e   :  { %v839_v16 = vmul.f32 0.5, %v838_v15 }
 0x870   :  { %v840_v17 = vsub.f32 1.5, %v839_v16 }
 0x872   :  { %v841_v18 = vmul.f32 %v2051_v13, %v840_v17 }
 0x874   :  { %v845_v19 = vsel %vm844_vm4, %v2051_v13, %v841_v18 }
 0x875   :  { %v847_v20 = vmul.f32 %v845_v19, %v813_v3 }
 0x877   :  { %v852_v21 = vmul.f32 %v2425_v31, %v847_v20 }
 0x879   :  { %v857_v22 = vadd.f32 %v2430_v34, %v852_v21 }
 0x87b   :  { %1905 = vmatmul.msk.f32.gmra.mxu0 %vm108_vm1, %v857_v22 }
 0x8a1   :  { %v958_v28 = vpop.xlane.xlu0 %957 }
 0x8a2   :  { %v962_v29 = vmul.f32 %v958_v28, %v2248_v23 }
 0x8a4   :  { %v964_v30 = vadd.f32 1e-05, %v962_v29 }
 0x8a6   :  { %2052 = vrsqrt.f32 %v964_v30  ;;  %vm972_vm6 = vweird.f32 %v964_v30 }
 0x8ac   :  { %v2053_v31 = vpop.eup %2052 }
 0x8ad   :  { %v967_v32 = vmul.f32 %v2053_v31, %v964_v30  ;;  %vm973_vm5 = vweird.f32 %v2053_v31 }
 0x8ae   :  { %vm974_vm7 = vmor %vm972_vm6, %vm973_vm5 }
 0x8af   :  { %v968_v33 = vmul.f32 %v2053_v31, %v967_v32 }
 0x8b1   :  { %v969_v34 = vmul.f32 0.5, %v968_v33 }
 0x8b3   :  { %v970_v35 = vsub.f32 1.5, %v969_v34 }
 0x8b5   :  { %v971_v36 = vmul.f32 %v2053_v31, %v970_v35 }
 0x8b7   :  { %v975_v38 = vsel %vm974_vm7, %v2053_v31, %v971_v36 }
 0x8b8   :  { %v986_v40 = vmul.f32 %v975_v38, %v952_v6 }
 0x8ba   :  { %v991_v41 = vmul.f32 %v2504_v37, %v986_v40 }
 0x8bc   :  { %v2510_v42 = vadd.f32 %v1994_v39, %v991_v41 }
 0x8be   :  { %1915 = vmatmul.msk.f32.vlgmr.msrb.gmra.mxu3 %vm108_vm1, %v2510_v42 }
 0x8f8   :  { %v892_v43 = vpop.f32.mrf.mxu0 }
 0x8f9   :  { %v893_v44 = vadd.f32 %v2466_v51, %v892_v43 }
 0x8fb   :  { %v896_v45 = vmax.f32 %v893_v44, 0.0 }
 0x8fd   :  { %1907 = vmatmul.msk.f32.gmra.mxu1 %vm76_vm0, %v896_v45 }
 0x941   :  { %v1031_v47 = vpop.f32.mrf.mxu3 }
 0x942   :  { %v1032_v48 = vadd.f32 %v2519_v46, %v1031_v47 }
 0x944   :  { %1037 = vst.msk [vmem:[#allocation2] sm:$0xff] %vm207_vm9, %v1032_v48 }
 0x94b   :  { %v2523_v49 = vld [vmem:[#allocation2] sm:$0xff] }
 0x94c   :  { %1106 = vrot.lane.b32.xlu1 %v2523_v49, %s2809_s4  ;;  %1041 = vrot.lane.b32.xlu0 %v2523_v49, %s2810_s24 }
 0x954   :  { %1236 = vrot.lane.b32.xlu1 %v2523_v49, %s2811_s3 }
 0x95c   :  { %1078 = vrot.lane.b32.xlu1 %v2523_v49, %s2107_s23 }
 0x964   :  { %1171 = vrot.lane.b32.xlu1 %v2523_v49, %s2812_s6 }
 0x97a   :  { %v935_v50 = vpop.f32.mrf.mxu1 }
 0x97b   :  { %v936_v51 = vadd.f32 %v2476_v61, %v935_v50 }
 0x97d   :  { %v939_v52 = vadd.f32 %v936_v51, %v857_v22 }
 0x97f   :  { %v947_v53 = vsel %vm108_vm1, %v939_v52, 0.0 }
 0x980   :  { %948 = vadd.xlane.f32.xlu2 %v947_v53 }
 0x9be   :  { %v1107_v54 = vpop.permute.xlu1 %1106  ;;  %v1042_v56 = vpop.permute.xlu0 %1041 }
 0x9bf   :  { %1917 = vmatpush.xpose.msk.msra.mxu2 %vm214_vm10, %v1042_v56  ;;  %1920 = vmatpush.xpose.msk.msra.mxu3 %vm214_vm10, %v1107_v54 }
 0x9c2   :  { %1918 = vmatmul.msk.f32.vlgmr.msra.gmra.mxu2 %vm214_vm10, %v2523_v49 }
 0x9c6   :  { %v1237_v57 = vpop.permute.xlu1 %1236 }
 0x9c7   :  { %1926 = vmatpush.xpose.msk.msrb.mxu3 %vm214_vm10, %v1237_v57 }
 0x9ce   :  { %v1079_v58 = vpop.permute.xlu1 %1078 }
 0x9cf   :  { %1099 = vmatpush.msrb.mxu0 %v1079_v58 }
 0x9d6   :  { %v1172_v59 = vpop.permute.xlu1 %1171 }
 0x9d7   :  { %1923 = vmatpush.xpose.msk.msra.mxu0 %vm214_vm10, %v1172_v59 }
 0x9f3   :  { %v949_v61 = vpop.xlane.xlu2 %948 }
 0x9f4   :  { %v951_v62 = vmul.f32 %v949_v61, %v2248_v23 }
 0x9f6   :  { %v953_v63 = vsub.f32 %v939_v52, %v951_v62 }
 0x9f8   :  { %v955_v0 = vmul.f32 %v953_v63, %v953_v63 }
 0x9fa   :  { %v959_v2 = vsel %vm108_vm1, %v955_v0, 0.0 }
 0x9fb   :  { %960 = vadd.xlane.f32.xlu2 %v959_v2 }
 0xa45   :  { %v1064_v8 = vpop.f32.mrf.mxu2 }
 0xa46   :  { %v1067_v55 = vsel %vm214_vm10, %v1064_v8, -inf }
 0xa47   :  { %1068 = vmax.xlane.f32.xlu2 %v1067_v55 }
 0xa5f   :  { %1104 = vrot.lane.b32.xlu2 %v2523_v49, %s2813_s20 }
 0xa67   :  { %1234 = vrot.lane.b32.xlu2 %v2523_v49, %s2814_s26 }
 0xa6e   :  { %v961_v3 = vpop.xlane.xlu2 %960 }
 0xa6f   :  { %v963_v1 = vmul.f32 %v961_v3, %v2248_v23 }
 0xa71   :  { %v965_v4 = vadd.f32 1e-05, %v963_v1 }
 0xa73   :  { %2054 = vrsqrt.f32 %v965_v4  ;;  %vm982_vm13 = vweird.f32 %v965_v4 }
 0xa79   :  { %v2055_v5 = vpop.eup %2054 }
 0xa7a   :  { %v977_v60 = vmul.f32 %v2055_v5, %v965_v4  ;;  %vm983_vm8 = vweird.f32 %v2055_v5 }
 0xa7b   :  { %vm984_vm14 = vmor %vm982_vm13, %vm983_vm8  ;;  %vm1867_vm8 = vcmask 15360  }
 0xa7c   :  { %v978_v6 = vmul.f32 %v2055_v5, %v977_v60 }
 0xa7e   :  { %v979_v7 = vmul.f32 0.5, %v978_v6 }
 0xa80   :  { %v980_v9 = vsub.f32 1.5, %v979_v7 }
 0xa82   :  { %v981_v10 = vmul.f32 %v2055_v5, %v980_v9 }
 0xa84   :  { %v985_v11 = vsel %vm984_vm14, %v2055_v5, %v981_v10 }
 0xa85   :  { %v987_v12 = vmul.f32 %v985_v11, %v953_v63 }
 0xa87   :  { %v992_v13 = vmul.f32 %v2504_v37, %v987_v12 }
 0xa89   :  { %v2552_v14 = vadd.f32 %v1994_v39, %v992_v13 }
 0xa8b   :  { %1916 = vmatmul.msk.f32.gmra.mxu3 %vm108_vm1, %v2552_v14 }
 0xaba   :  { %v1069_v15 = vpop.xlane.xlu2 %1068 }
 0xabb   :  { %v1070_v16 = vsub.f32 %v1064_v8, %v1069_v15 }
 0xabd   :  { %v1071_v17 = vmul.f32 1.442695, %v1070_v16 }
 0xabf   :  { %2056 = vpow2.f32 %v1071_v17 }
 0xac2   :  { %v1105_v18 = vpop.permute.xlu2 %1104 }
 0xac3   :  { %1921 = vmatmul.msk.f32.vlgmr.msra.gmra.mxu3 %vm214_vm10, %v1105_v18 }
 0xac5   :  { %v2057_v19 = vpop.eup %2056 }
 0xac6   :  { %v1073_v20 = vsel %vm214_vm10, %v2057_v19, 0.0 }
 0xac7   :  { %1074 = vadd.xlane.f32.xlu0 %v1073_v20 }
 0xaca   :  { %v1235_v21 = vpop.permute.xlu2 %1234 }
 0xacb   :  { %1927 = vmatmul.msk.f32.vlgmr.msrb.gmra.mxu3 %vm214_vm10, %v1235_v21 }
 0xadb   :  { %1169 = vrot.lane.b32.xlu0 %v2523_v49, %s2815_s27 }
 0xb0e   :  { %v1034_v22 = vpop.f32.mrf.mxu3 }
 0xb0f   :  { %v1035_v24 = vadd.f32 %v2519_v46, %v1034_v22 }
 0xb11   :  { %1038 = vst.msk [vmem:[#allocation2 + $0x8] sm:$0xff] %vm207_vm9, %v1035_v24 }
 0xb18   :  { %v2563_v25 = vld [vmem:[#allocation2 + $0x8] sm:$0xff] }
 0xb19   :  { %1511 = vrot.lane.b32.xlu1 %v2563_v25, %s2811_s3  ;;  %1381 = vrot.lane.b32.xlu2 %v2563_v25, %s2809_s4  ;;  %v1985_v8 = vpack.i.bf16 %v2563_v25, %v2523_v49 }
 0xb21   :  { %1509 = vrot.lane.b32.xlu1 %v2563_v25, %s2814_s26  ;;  %1379 = vrot.lane.b32.xlu2 %v2563_v25, %s2813_s20 }
 0xb29   :  { %1444 = vrot.lane.b32.xlu1 %v2563_v25, %s2815_s27  ;;  %1316 = vrot.lane.b32.xlu2 %v2563_v25, %s2810_s24 }
 0xb31   :  { %1446 = vrot.lane.b32.xlu2 %v2563_v25, %s2812_s6 }
 0xb3a   :  { %v1075_v26 = vpop.xlane.xlu0 %1074 }
 0xb3b   :  { %2058 = vrcp.f32 %v1075_v26 }
 0xb41   :  { %v2059_v27 = vpop.eup %2058 }
 0xb42   :  { %v1077_v28 = vmul.f32 %v2059_v27, %v2057_v19 }
 0xb44   :  { %1919 = vmatmul.msk.f32.vlgmr.msrb.gmra.mxu0 %vm214_vm10, %v1077_v28 }
 0xb46   :  { %v1129_v29 = vpop.f32.mrf.mxu3 }
 0xb47   :  { %v1132_v33 = vsel %vm214_vm10, %v1129_v29, -inf }
 0xb4d   :  { %v1170_v30 = vpop.permute.xlu0 %1169 }
 0xb4e   :  { %1924 = vmatmul.msk.f32.vlgmr.msra.gmra.mxu0 %vm214_vm10, %v1170_v30  ;;  %v1259_v31 = vpop.f32.mrf.mxu3 }
 0xb4f   :  { %v1262_v32 = vsel %vm214_vm10, %v1259_v31, -inf }
 0xb50   :  { %1263 = vmax.xlane.f32.xlu0 %v1262_v32 }
 0xb5a   :  { %1133 = vmax.xlane.f32.xlu2 %v1132_v33 }
 0xb73   :  { %v1382_v34 = vpop.permute.xlu2 %1381 }
 0xb74   :  { %1932 = vmatpush.xpose.msk.msra.mxu3 %vm214_vm10, %v1382_v34 }
 0xb7b   :  { %v1380_v35 = vpop.permute.xlu2 %1379 }
 0xb7c   :  { %1933 = vmatmul.msk.f32.vlgmr.msra.gmra.mxu3 %vm214_vm10, %v1380_v35 }
 0xb83   :  { %v1317_v36 = vpop.permute.xlu2 %1316 }
 0xb84   :  { %1929 = vmatpush.xpose.msk.msrb.mxu0 %vm214_vm10, %v1317_v36 }
 0xb87   :  { %1930 = vmatmul.msk.f32.vlgmr.msrb.gmra.mxu0 %vm214_vm10, %v2563_v25 }
 0xb8b   :  { %v1512_v37 = vpop.permute.xlu1 %1511  ;;  %v1447_v38 = vpop.permute.xlu2 %1446 }
 0xb8c   :  { %1935 = vmatpush.xpose.msk.msra.mxu0 %vm214_vm10, %v1447_v38  ;;  %1938 = vmatpush.xpose.msk.msrb.mxu3 %vm214_vm10, %v1512_v37 }
 0xb93   :  { %v1510_v39 = vpop.permute.xlu1 %1509 }
 0xb94   :  { %1939 = vmatmul.msk.f32.vlgmr.msrb.gmra.mxu3 %vm214_vm10, %v1510_v39 }
 0xb9b   :  { %v1445_v40 = vpop.permute.xlu1 %1444 }
 0xb9c   :  { %1936 = vmatmul.msk.f32.vlgmr.msra.gmra.mxu0 %vm214_vm10, %v1445_v40 }
 0xbc1   :  { %v2592_v45 = vpop.f32.mrf.mxu0 }
 0xbc3   :  { %v1264_v41 = vpop.xlane.xlu0 %1263 }
 0xbc4   :  { %v1265_v43 = vsub.f32 %v1259_v31, %v1264_v41 }
 0xbc6   :  { %v1266_v44 = vmul.f32 1.442695, %v1265_v43 }
 0xbc8   :  { %2060 = vpow2.f32 %v1266_v44 }
 0xbcb   :  { %v1194_v52 = vpop.f32.mrf.mxu0 }
 0xbcc   :  { %v1197_v53 = vsel %vm214_vm10, %v1194_v52, -inf }
 0xbcd   :  { %v1134_v46 = vpop.xlane.xlu2 %1133 }
 0xbce   :  { %v2594_v47 = vpop.eup %2060  ;;  %v1135_v48 = vsub.f32 %v1129_v29, %v1134_v46 }
 0xbcf   :  { %v1268_v50 = vsel %vm214_vm10, %v2594_v47, 0.0 }
 0xbd0   :  { %v1136_v51 = vmul.f32 1.442695, %v1135_v48  ;;  %1269 = vadd.xlane.f32.xlu1 %v1268_v50 }
 0xbd2   :  { %2062 = vpow2.f32 %v1136_v51 }
 0xbd8   :  { %v2063_v54 = vpop.eup %2062  ;;  %1198 = vmax.xlane.f32.xlu1 %v1197_v53 }
 0xbd9   :  { %v1138_v56 = vsel %vm214_vm10, %v2063_v54, 0.0 }
 0xbda   :  { %1139 = vadd.xlane.f32.xlu0 %v1138_v56 }
 0xbff   :  { %v1404_v57 = vpop.f32.mrf.mxu3 }
 0xc00   :  { %v1407_v58 = vsel %vm214_vm10, %v1404_v57, -inf }
 0xc01   :  { %1408 = vmax.xlane.f32.xlu2 %v1407_v58 }
 0xc04   :  { %v1339_v59 = vpop.f32.mrf.mxu0 }
 0xc05   :  { %v1342_v61 = vsel %vm214_vm10, %v1339_v59, -inf }
 0xc06   :  { %1343 = vmax.xlane.f32.xlu0 %v1342_v61 }
 0xc17   :  { %v1534_v62 = vpop.f32.mrf.mxu3 }
 0xc18   :  { %v1537_v63 = vsel %vm214_vm10, %v1534_v62, -inf }
 0xc19   :  { %1538 = vmax.xlane.f32.xlu1 %v1537_v63  ;;  %v1469_v0 = vpop.f32.mrf.mxu0 }
 0xc1a   :  { %v1472_v2 = vsel %vm214_vm10, %v1469_v0, -inf }
 0xc1b   :  { %1473 = vmax.xlane.f32.xlu2 %v1472_v2 }
 0xc32   :  { %1208 = vrot.lane.b32.xlu1 %v2523_v49, %s2100_s28 }
 0xc33   :  { %1986 = vrot.lane.b32.xlu2 %v1985_v8, %s2816_s29 }
 0xc43   :  { %v1270_v55 = vpop.xlane.xlu1 %1269 }
 0xc4b   :  { %v1199_v3 = vpop.xlane.xlu1 %1198 }
 0xc4c   :  { %v1200_v1 = vsub.f32 %v1194_v52, %v1199_v3  ;;  %v1944_v3 = vld [vmem:[%s2766_s7 + $0x38] sm:$0xff] }
 0xc4d   :  { %v1140_v6 = vpop.xlane.xlu0 %1139  ;;  %1617 = vmatpush.msrb.mxu0 %v1944_v3 }
 0xc4e   :  { %v1201_v4 = vmul.f32 1.442695, %v1200_v1  ;;  %v1943_v1 = vld [vmem:[%s2766_s7 + $0x30] sm:$0xff] }
 0xc4f   :  { %1618 = vmatpush.msrb.mxu0 %v1943_v1 }
 0xc50   :  { %2064 = vpow2.f32 %v1201_v4  ;;  %v1942_v4 = vld [vmem:[%s2766_s7 + $0x28] sm:$0xff] }
 0xc51   :  { %1619 = vmatpush.msrb.mxu0 %v1942_v4 }
 0xc56   :  { %v2065_v5 = vpop.eup %2064 }
 0xc57   :  { %v1203_v60 = vsel %vm214_vm10, %v2065_v5, 0.0 }
 0xc58   :  { %1204 = vadd.xlane.f32.xlu0 %v1203_v60 }
 0xc6c   :  { %1273 = vrot.lane.b32.xlu0 %v2523_v49, %s2106_s22 }
 0xc74   :  { %v1409_v7 = vpop.xlane.xlu2 %1408 }
 0xc75   :  { %v1410_v9 = vsub.f32 %v1404_v57, %v1409_v7 }
 0xc77   :  { %v1411_v10 = vmul.f32 1.442695, %v1410_v9 }
 0xc79   :  { %2066 = vpow2.f32 %v1411_v10  ;;  %v1344_v11 = vpop.xlane.xlu0 %1343 }
 0xc7a   :  { %v1345_v12 = vsub.f32 %v1339_v59, %v1344_v11 }
 0xc7c   :  { %v1346_v13 = vmul.f32 1.442695, %v1345_v12 }
 0xc7e   :  { %2068 = vpow2.f32 %v1346_v13 }
 0xc7f   :  { %v2067_v15 = vpop.eup %2066  ;;  %2070 = vrcp.f32 %v1140_v6 }
 0xc80   :  { %v1413_v16 = vsel %vm214_vm10, %v2067_v15, 0.0 }
 0xc81   :  { %1414 = vadd.xlane.f32.xlu1 %v1413_v16 }
 0xc84   :  { %v2069_v17 = vpop.eup %2068 }
 0xc85   :  { %v1348_v18 = vsel %vm214_vm10, %v2069_v17, 0.0  ;;  %v2071_v26 = vpop.eup %2070 }
 0xc86   :  { %v1142_v30 = vmul.f32 %v2071_v26, %v2063_v54 }
 0xc89   :  { %1349 = vadd.xlane.f32.xlu1 %v1348_v18 }
 0xc8c   :  { %v1539_v19 = vpop.xlane.xlu1 %1538 }
 0xc8d   :  { %v1540_v20 = vsub.f32 %v1534_v62, %v1539_v19 }
 0xc8e   :  { %v1474_v49 = vpop.xlane.xlu2 %1473 }
 0xc8f   :  { %v1541_v21 = vmul.f32 1.442695, %v1540_v20  ;;  %v1475_v22 = vsub.f32 %v1469_v0, %v1474_v49 }
 0xc91   :  { %2072 = vpow2.f32 %v1541_v21  ;;  %v1476_v24 = vmul.f32 1.442695, %v1475_v22 }
 0xc93   :  { %2074 = vpow2.f32 %v1476_v24 }
 0xc96   :  { %v1987_v27 = vpop.permute.xlu2 %1986 }
 0xc97   :  { %v2073_v28 = vpop.eup %2072  ;;  %v1988_v29 = vunpack.i.l.bf16 %v1987_v27  ;;  %v1989_v41 = vunpack.i.h.bf16 %v1987_v27 }
 0xc98   :  { %v1543_v31 = vsel %vm214_vm10, %v2073_v28, 0.0 }
 0xc99   :  { %v2075_v32 = vpop.eup %2074  ;;  %1544 = vadd.xlane.f32.xlu2 %v1543_v31  ;;  %1164 = vmatpush.msrb.mxu2 %v1988_v29 }
 0xc9a   :  { %1922 = vmatmul.msk.f32.vlgmr.msrb.gmra.mxu2 %vm214_vm10, %v1142_v30  ;;  %v1478_v33 = vsel %vm214_vm10, %v2075_v32, 0.0 }
 0xc9b   :  { %1479 = vadd.xlane.f32.xlu0 %v1478_v33 }
 0xca2   :  { %1353 = vrot.lane.b32.xlu1 %v2563_v25, %s2107_s23 }
 0xca4   :  { %v1209_v34 = vpop.permute.xlu1 %1208 }
 0xca5   :  { %1229 = vmatpush.msrb.mxu1 %v1209_v34 }
 0xcaa   :  { %1548 = vrot.lane.b32.xlu1 %v2563_v25, %s2106_s22  ;;  %s2818_s22 = smov 24  }
 0xcb2   :  { %1483 = vrot.lane.b32.xlu1 %v2563_v25, %s2100_s28  ;;  %s2817_s28 = smov 16  }
 0xccb   :  { %v1205_v35 = vpop.xlane.xlu0 %1204 }
 0xccc   :  { %2076 = vrcp.f32 %v1205_v35 }
 0xccd   :  { %2078 = vrcp.f32 %v1270_v55 }
 0xcd2   :  { %v2077_v36 = vpop.eup %2076 }
 0xcd3   :  { %v1207_v37 = vmul.f32 %v2077_v36, %v2065_v5  ;;  %v2079_v38 = vpop.eup %2078  ;;  %v1941_v5 = vld [vmem:[%s2766_s7 + $0x20] sm:$0xff] }
 0xcd4   :  { %v1272_v39 = vmul.f32 %v2079_v38, %v2594_v47  ;;  %1620 = vmatpush.msrb.mxu0 %v1941_v5  ;;  %v1951_v38 = vld [vmem:[%s2771_s11 + $0x28] sm:$0xff] }
 0xcd5   :  { %1925 = vmatmul.msk.f32.vlgmr.msrb.gmra.mxu1 %vm214_vm10, %v1207_v37  ;;  %v1952_v37 = vld [vmem:[%s2771_s11 + $0x30] sm:$0xff] }
 0xcde   :  { %v1274_v40 = vpop.permute.xlu0 %1273 }
 0xcdf   :  { %1294 = vmatpush.msra.mxu2 %v1274_v40 }
 0xce0   :  { %1928 = vmatmul.msk.f32.vlgmr.msra.gmra.mxu2 %vm214_vm10, %v1272_v39  ;;  %v1950_v39 = vld [vmem:[%s2771_s11 + $0x20] sm:$0xff] }
 0xce1   :  { %1439 = vmatpush.msrb.mxu2 %v1989_v41 }
 0xcf4   :  { %v1415_v43 = vpop.xlane.xlu1 %1414 }
 0xcf5   :  { %2080 = vrcp.f32 %v1415_v43 }
 0xcfb   :  { %v2081_v44 = vpop.eup %2080 }
 0xcfc   :  { %v1417_v25 = vmul.f32 %v2081_v44, %v2067_v15  ;;  %v1350_v46 = vpop.xlane.xlu1 %1349 }
 0xcfd   :  { %2082 = vrcp.f32 %v1350_v46 }
 0xcfe   :  { %1934 = vmatmul.msk.f32.vlgmr.msrb.gmra.mxu2 %vm214_vm10, %v1417_v25 }
 0xd03   :  { %v2083_v50 = vpop.eup %2082 }
 0xd04   :  { %v1352_v51 = vmul.f32 %v2083_v50, %v2069_v17 }
 0xd0c   :  { %v1545_v48 = vpop.xlane.xlu2 %1544 }
 0xd0d   :  { %2084 = vrcp.f32 %v1545_v48 }
 0xd0e   :  { %v1480_v47 = vpop.xlane.xlu0 %1479 }
 0xd0f   :  { %2086 = vrcp.f32 %v1480_v47 }
 0xd13   :  { %v2085_v53 = vpop.eup %2084 }
 0xd14   :  { %v1354_v52 = vpop.permute.xlu1 %1353  ;;  %v1547_v54 = vmul.f32 %v2085_v53, %v2073_v28 }
 0xd15   :  { %1374 = vmatpush.msra.mxu1 %v1354_v52  ;;  %v2087_v58 = vpop.eup %2086  ;;  %v2003_v52 = vld [vmem:[%s2768_s9 + $0x1] ss:$0 sm:$0xff] }
 0xd16   :  { %1931 = vmatmul.msk.f32.vlgmr.msra.gmra.mxu1 %vm214_vm10, %v1352_v51  ;;  %v1482_v59 = vmul.f32 %v2087_v58, %v2075_v32  ;;  %v1964_v58 = vld [vmem:[%s2772_s13 + $0x78] sm:$0xff] }
 0xd17   :  { %1757 = vmatpush.msra.mxu3 %v1964_v58  ;;  %v2008_v58 = vld [vmem:[%s2775_s16] ss:$0 sm:$0xff] }
 0xd1c   :  { %v1549_v56 = vpop.permute.xlu1 %1548 }
 0xd1d   :  { %v1166_v57 = vpop.f32.mrf.mxu2  ;;  %1569 = vmatpush.msra.mxu2 %v1549_v56 }
 0xd1e   :  { %1940 = vmatmul.msk.f32.vlgmr.msra.gmra.mxu2 %vm214_vm10, %v1547_v54  ;;  %1300 = vrot.lane.b32.xlu2 %v1166_v57, %s2109_s25  ;;  %v2004_v54 = vld [vmem:[%s2769_s10 + $0x1] ss:$0 sm:$0xff] }
 0xd24   :  { %v1484_v61 = vpop.permute.xlu1 %1483 }
 0xd25   :  { %1504 = vmatpush.msrb.mxu1 %v1484_v61  ;;  %v1962_v61 = vld [vmem:[%s2772_s13 + $0x68] sm:$0xff] }
 0xd26   :  { %1937 = vmatmul.msk.f32.vlgmr.msrb.gmra.mxu1 %vm214_vm10, %v1482_v59  ;;  %v1963_v59 = vld [vmem:[%s2772_s13 + $0x70] sm:$0xff] }
 0xd27   :  { %1758 = vmatpush.msra.mxu3 %v1963_v59 }
 0xd29   :  { %1759 = vmatpush.msra.mxu3 %v1962_v61 }
 0xd52   :  { %v1231_v62 = vpop.f32.mrf.mxu1 }
 0xd53   :  { %1304 = vrot.lane.b32.xlu0 %v1231_v62, %s2817_s28 }
 0xd63   :  { %v1296_v63 = vpop.f32.mrf.mxu2 }
 0xd64   :  { %1308 = vrot.lane.b32.xlu1 %v1296_v63, %s2818_s22 }
 0xd78   :  { %v1301_v60 = vpop.permute.xlu2 %1300 }
 0xd79   :  { %v1311_v7 = vsel %vm214_vm10, %v2592_v45, %v1301_v60  ;;  %v2002_v45 = vld [vmem:[%s2767_s8 + $0x1] ss:$0 sm:$0xff] }
 0xd81   :  { %v1441_v0 = vpop.f32.mrf.mxu2 }
 0xd82   :  { %1575 = vrot.lane.b32.xlu1 %v1441_v0, %s2109_s25  ;;  %v1961_v0 = vld [vmem:[%s2772_s13 + $0x60] sm:$0xff] }
 0xd83   :  { %1760 = vmatpush.msra.mxu3 %v1961_v0 }
 0xd93   :  { %v1376_v2 = vpop.f32.mrf.mxu1 }
 0xda1   :  { %v1571_v8 = vpop.f32.mrf.mxu2 }
 0xda2   :  { %1583 = vrot.lane.b32.xlu2 %v1571_v8, %s2818_s22  ;;  %v1960_v8 = vld [vmem:[%s2772_s13 + $0x58] sm:$0xff] }
 0xda3   :  { %v1506_v55 = vpop.f32.mrf.mxu1  ;;  %1761 = vmatpush.msra.mxu3 %v1960_v8 }
 0xda4   :  { %1579 = vrot.lane.b32.xlu1 %v1506_v55, %s2817_s28 }
 0xdc5   :  { %v1305_v6 = vpop.permute.xlu0 %1304 }
 0xdc6   :  { %v1312_v9 = vsel %vm484_vm11, %v1311_v7, %v1305_v6 }
 0xdd6   :  { %v1309_v10 = vpop.permute.xlu1 %1308 }
 0xdd7   :  { %v1313_v11 = vsel %vm486_vm12, %v1312_v9, %v1309_v10 }
 0xdd8   :  { %1946 = vmatmul.msk.f32.vlgmr.msrb.gmra.mxu0 %vm108_vm1, %v1313_v11  ;;  %v1959_v11 = vld [vmem:[%s2772_s13 + $0x50] sm:$0xff] }
 0xdd9   :  { %1762 = vmatpush.msra.mxu3 %v1959_v11 }
 0xdf4   :  { %v1576_v12 = vpop.permute.xlu1 %1575 }
 0xdf5   :  { %v1586_v13 = vsel %vm214_vm10, %v1376_v2, %v1576_v12  ;;  %v1958_v12 = vld [vmem:[%s2772_s13 + $0x48] sm:$0xff] }
 0xdf6   :  { %1763 = vmatpush.msra.mxu3 %v1958_v12 }
 0xdfc   :  { %v1584_v16 = vpop.permute.xlu2 %1583 }
 0xe16   :  { %v1580_v15 = vpop.permute.xlu1 %1579 }
 0xe17   :  { %v1587_v17 = vsel %vm484_vm11, %v1586_v13, %v1580_v15  ;;  %v1957_v13 = vld [vmem:[%s2772_s13 + $0x40] sm:$0xff] }
 0xe18   :  { %v1588_v18 = vsel %vm486_vm12, %v1587_v17, %v1584_v16  ;;  %1764 = vmatpush.msra.mxu3 %v1957_v13  ;;  %v2005_v15 = vld [vmem:[%s2770_s12 + $0x1] ss:$0 sm:$0xff] }
 0xe19   :  { %1947 = vmatmul.msk.f32.gmra.mxu0 %vm108_vm1, %v1588_v18 }
 0xe55   :  { %v1622_v19 = vpop.f32.mrf.mxu0 }
 0xe56   :  { %v1623_v20 = vadd.f32 %v2002_v45, %v1622_v19 }
 0xe58   :  { %v1628_v49 = vadd.f32 %v1623_v20, %v2510_v42 }
 0xe5a   :  { %v1634_v21 = vsel %vm108_vm1, %v1628_v49, 0.0 }
 0xe5b   :  { %1635 = vadd.xlane.f32.xlu0 %v1634_v21 }
 0xe96   :  { %v1625_v22 = vpop.f32.mrf.mxu0 }
 0xe97   :  { %v1626_v24 = vadd.f32 %v2002_v45, %v1625_v22 }
 0xe99   :  { %v1629_v26 = vadd.f32 %v1626_v24, %v2552_v14  ;;  %v1953_v14 = vld [vmem:[%s2771_s11 + $0x38] sm:$0xff] }
 0xe9a   :  { %1716 = vmatpush.msra.mxu1 %v1953_v14 }
 0xe9b   :  { %v1637_v27 = vsel %vm108_vm1, %v1629_v26, 0.0 }
 0xe9c   :  { %1638 = vadd.xlane.f32.xlu1 %v1637_v27  ;;  %1717 = vmatpush.msra.mxu1 %v1952_v37 }
 0xe9e   :  { %1718 = vmatpush.msra.mxu1 %v1951_v38 }
 0xea0   :  { %1719 = vmatpush.msra.mxu1 %v1950_v39  ;;  %v1833_v39 = vld [vmem:[%s2777_s17 + $0x18] sm:$0xff] }
 0xea1   :  { %1856 = vmatpush.msrb.mxu2 %v1833_v39 }
 0xece   :  { %v1636_v28 = vpop.xlane.xlu0 %1635 }
 0xecf   :  { %v1640_v29 = vmul.f32 %v1636_v28, %v2248_v23 }
 0xed1   :  { %v1642_v30 = vsub.f32 %v1628_v49, %v1640_v29  ;;  %v2006_v49 = vld [vmem:[%s2773_s14 + $0x1] ss:$0 sm:$0xff] }
 0xed3   :  { %v1644_v31 = vmul.f32 %v1642_v30, %v1642_v30 }
 0xed5   :  { %v1646_v32 = vsel %vm108_vm1, %v1644_v31, 0.0 }
 0xed6   :  { %1647 = vadd.xlane.f32.xlu2 %v1646_v32 }
 0xf0f   :  { %v1639_v33 = vpop.xlane.xlu1 %1638 }
 0xf10   :  { %v1641_v42 = vmul.f32 %v1639_v33, %v2248_v23 }
 0xf12   :  { %v1643_v34 = vsub.f32 %v1629_v26, %v1641_v42 }
 0xf14   :  { %v1645_v35 = vmul.f32 %v1643_v34, %v1643_v34 }
 0xf16   :  { %v1649_v36 = vsel %vm108_vm1, %v1645_v35, 0.0 }
 0xf17   :  { %1650 = vadd.xlane.f32.xlu0 %v1649_v36 }
 0xf49   :  { %v1648_v40 = vpop.xlane.xlu2 %1647 }
 0xf4a   :  { %v1652_v41 = vmul.f32 %v1648_v40, %v2248_v23  ;;  %v1832_v40 = vld [vmem:[%s2777_s17 + $0x10] sm:$0xff] }
 0xf4b   :  { %1857 = vmatpush.msrb.mxu2 %v1832_v40 }
 0xf4c   :  { %v1654_v43 = vadd.f32 1e-05, %v1652_v41  ;;  %v1831_v41 = vld [vmem:[%s2777_s17 + $0x8] sm:$0xff] }
 0xf4d   :  { %1858 = vmatpush.msrb.mxu2 %v1831_v41 }
 0xf4e   :  { %2088 = vrsqrt.f32 %v1654_v43  ;;  %vm1662_vm10 = vweird.f32 %v1654_v43 }
 0xf54   :  { %v2089_v44 = vpop.eup %2088 }
 0xf55   :  { %v1657_v25 = vmul.f32 %v2089_v44, %v1654_v43  ;;  %vm1663_vm9 = vweird.f32 %v2089_v44  ;;  %v1830_v43 = vld [vmem:[%s2777_s17] sm:$0xff] }
 0xf56   :  { %vm1664_vm11 = vmor %vm1662_vm10, %vm1663_vm9  ;;  %1859 = vmatpush.msrb.mxu2 %v1830_v43 }
 0xf57   :  { %v1658_v46 = vmul.f32 %v2089_v44, %v1657_v25 }
 0xf59   :  { %v1659_v48 = vmul.f32 0.5, %v1658_v46 }
 0xf5b   :  { %v1660_v50 = vsub.f32 1.5, %v1659_v48 }
 0xf5d   :  { %v1661_v51 = vmul.f32 %v2089_v44, %v1660_v50 }
 0xf5f   :  { %v1665_v47 = vsel %vm1664_vm11, %v2089_v44, %v1661_v51 }
 0xf60   :  { %v1676_v53 = vmul.f32 %v1665_v47, %v1642_v30 }
 0xf62   :  { %v1681_v56 = vmul.f32 %v2003_v52, %v1676_v53 }
 0xf64   :  { %v1686_v57 = vadd.f32 %v2004_v54, %v1681_v56 }
 0xf66   :  { %1955 = vmatmul.msk.f32.vlgmr.msra.gmra.mxu1 %vm108_vm1, %v1686_v57 }
 0xf8a   :  { %v1651_v62 = vpop.xlane.xlu0 %1650 }
 0xf8b   :  { %v1653_v63 = vmul.f32 %v1651_v62, %v2248_v23 }
 0xf8d   :  { %v1655_v2 = vadd.f32 1e-05, %v1653_v63 }
 0xf8f   :  { %2090 = vrsqrt.f32 %v1655_v2  ;;  %vm1672_vm15 = vweird.f32 %v1655_v2 }
 0xf95   :  { %v2091_v55 = vpop.eup %2090 }
 0xf96   :  { %v1667_v3 = vmul.f32 %v2091_v55, %v1655_v2  ;;  %vm1673_vm12 = vweird.f32 %v2091_v55 }
 0xf97   :  { %vm1674_vm2 = vmor %vm1672_vm15, %vm1673_vm12 }
 0xf98   :  { %v1668_v1 = vmul.f32 %v2091_v55, %v1667_v3 }
 0xf9a   :  { %v1669_v4 = vmul.f32 0.5, %v1668_v1 }
 0xf9c   :  { %v1670_v5 = vsub.f32 1.5, %v1669_v4 }
 0xf9e   :  { %v1671_v60 = vmul.f32 %v2091_v55, %v1670_v5 }
 0xfa0   :  { %v1675_v6 = vsel %vm1674_vm2, %v2091_v55, %v1671_v60 }
 0xfa1   :  { %v1677_v7 = vmul.f32 %v1675_v6, %v1643_v34 }
 0xfa3   :  { %v1682_v9 = vmul.f32 %v2003_v52, %v1677_v7 }
 0xfa5   :  { %v1687_v10 = vadd.f32 %v2004_v54, %v1682_v9  ;;  %v2007_v54 = vld [vmem:[%s2774_s15] ss:$0 sm:$0xff] }
 0xfa7   :  { %1956 = vmatmul.msk.f32.gmra.mxu1 %vm108_vm1, %v1687_v10 }
 0xfe3   :  { %v1721_v16 = vpop.f32.mrf.mxu1 }
 0xfe4   :  { %v1722_v17 = vadd.f32 %v2005_v15, %v1721_v16 }
 0xfe6   :  { %v1727_v18 = vmax.f32 %v1722_v17, 0.0 }
 0xfe8   :  { %1966 = vmatmul.msk.f32.vlgmr.msra.gmra.mxu3 %vm76_vm0, %v1727_v18 }
0x1024   :  { %v1724_v45 = vpop.f32.mrf.mxu1 }
0x1025   :  { %v1725_v19 = vadd.f32 %v2005_v15, %v1724_v45 }
0x1027   :  { %v1728_v20 = vmax.f32 %v1725_v19, 0.0 }
0x1029   :  { %1967 = vmatmul.msk.f32.gmra.mxu3 %vm76_vm0, %v1728_v20 }
0x106b   :  { %v1766_v21 = vpop.f32.mrf.mxu3 }
0x106c   :  { %v1767_v22 = vadd.f32 %v2006_v49, %v1766_v21 }
0x106e   :  { %v1772_v24 = vadd.f32 %v1767_v22, %v1686_v57 }
0x1070   :  { %v1776_v26 = vsel %vm108_vm1, %v1772_v24, 0.0 }
0x1071   :  { %1777 = vadd.xlane.f32.xlu2 %v1776_v26 }
0x10ac   :  { %v1769_v27 = vpop.f32.mrf.mxu3 }
0x10ad   :  { %v1770_v28 = vadd.f32 %v2006_v49, %v1769_v27 }
0x10af   :  { %v1773_v29 = vadd.f32 %v1770_v28, %v1687_v10 }
0x10b1   :  { %v1779_v30 = vsel %vm108_vm1, %v1773_v29, 0.0 }
0x10b2   :  { %1780 = vadd.xlane.f32.xlu1 %v1779_v30 }
0x10e4   :  { %v1778_v31 = vpop.xlane.xlu2 %1777 }
0x10e5   :  { %v1782_v32 = vmul.f32 %v1778_v31, %v2248_v23 }
0x10e7   :  { %v1784_v33 = vsub.f32 %v1772_v24, %v1782_v32 }
0x10e9   :  { %v1786_v42 = vmul.f32 %v1784_v33, %v1784_v33 }
0x10eb   :  { %v1788_v34 = vsel %vm108_vm1, %v1786_v42, 0.0 }
0x10ec   :  { %1789 = vadd.xlane.f32.xlu0 %v1788_v34 }
0x1125   :  { %v1781_v35 = vpop.xlane.xlu1 %1780 }
0x1126   :  { %v1783_v36 = vmul.f32 %v1781_v35, %v2248_v23 }
0x1128   :  { %v1785_v14 = vsub.f32 %v1773_v29, %v1783_v36 }
0x112a   :  { %v1787_v37 = vmul.f32 %v1785_v14, %v1785_v14 }
0x112c   :  { %v1791_v38 = vsel %vm108_vm1, %v1787_v37, 0.0 }
0x112d   :  { %1792 = vadd.xlane.f32.xlu2 %v1791_v38 }
0x115f   :  { %v1790_v44 = vpop.xlane.xlu0 %1789 }
0x1160   :  { %v1794_v25 = vmul.f32 %v1790_v44, %v2248_v23 }
0x1162   :  { %v1796_v46 = vadd.f32 1e-05, %v1794_v25 }
0x1164   :  { %2092 = vrsqrt.f32 %v1796_v46  ;;  %vm1804_vm3 = vweird.f32 %v1796_v46 }
0x116a   :  { %v2093_v48 = vpop.eup %2092 }
0x116b   :  { %v1799_v50 = vmul.f32 %v2093_v48, %v1796_v46  ;;  %vm1805_vm0 = vweird.f32 %v2093_v48 }
0x116c   :  { %vm1806_vm4 = vmor %vm1804_vm3, %vm1805_vm0 }
0x116d   :  { %v1800_v51 = vmul.f32 %v2093_v48, %v1799_v50 }
0x116f   :  { %v1801_v52 = vmul.f32 0.5, %v1800_v51 }
0x1171   :  { %v1802_v47 = vsub.f32 1.5, %v1801_v52 }
0x1173   :  { %v1803_v53 = vmul.f32 %v2093_v48, %v1802_v47 }
0x1175   :  { %v1807_v56 = vsel %vm1806_vm4, %v2093_v48, %v1803_v53 }
0x1176   :  { %v1818_v57 = vmul.f32 %v1807_v56, %v1784_v33 }
0x1178   :  { %v1823_v59 = vmul.f32 %v2007_v54, %v1818_v57 }
0x117a   :  { %v1828_v61 = vadd.f32 %v2008_v58, %v1823_v59 }
0x117c   :  { %1968 = vmatmul.msk.f32.vlgmr.msrb.gmra.mxu2 %vm108_vm1, %v1828_v61 }
0x11a0   :  { %v1793_v62 = vpop.xlane.xlu2 %1792 }
0x11a1   :  { %v1795_v63 = vmul.f32 %v1793_v62, %v2248_v23  ;;  %v2009_v23 = vld [vmem:[%s2776_s18] ss:$0 sm:$0xff] }
0x11a3   :  { %v1797_v0 = vadd.f32 1e-05, %v1795_v63 }
0x11a5   :  { %2094 = vrsqrt.f32 %v1797_v0  ;;  %vm1814_vm6 = vweird.f32 %v1797_v0 }
0x11ab   :  { %v2095_v2 = vpop.eup %2094 }
0x11ac   :  { %v1809_v8 = vmul.f32 %v2095_v2, %v1797_v0  ;;  %vm1815_vm5 = vweird.f32 %v2095_v2 }
0x11ad   :  { %vm1816_vm7 = vmor %vm1814_vm6, %vm1815_vm5 }
0x11ae   :  { %v1810_v55 = vmul.f32 %v2095_v2, %v1809_v8 }
0x11b0   :  { %v1811_v3 = vmul.f32 0.5, %v1810_v55 }
0x11b2   :  { %v1812_v1 = vsub.f32 1.5, %v1811_v3 }
0x11b4   :  { %v1813_v4 = vmul.f32 %v2095_v2, %v1812_v1 }
0x11b6   :  { %v1817_v5 = vsel %vm1816_vm7, %v2095_v2, %v1813_v4 }
0x11b7   :  { %v1819_v60 = vmul.f32 %v1817_v5, %v1785_v14 }
0x11b9   :  { %v1824_v6 = vmul.f32 %v2007_v54, %v1819_v60 }
0x11bb   :  { %v1829_v7 = vadd.f32 %v2008_v58, %v1824_v6 }
0x11bd   :  { %1969 = vmatmul.msk.f32.gmra.mxu2 %vm108_vm1, %v1829_v7 }
0x11ff   :  { %v1861_v9 = vpop.f32.mrf.mxu2 }
0x1200   :  { %v1862_v10 = vadd.f32 %v2009_v23, %v1861_v9 }
0x1202   :  { %1868 = vst.msk [vmem:[%s2778_s19] sm:$0xff] %vm1867_vm8, %v1862_v10 }
0x1240   :  { %v1864_v11 = vpop.f32.mrf.mxu2 }
0x1241   :  { %v1865_v12 = vadd.f32 %v2009_v23, %v1864_v11 }
0x1243   :  { %1869 = vst.msk [vmem:[%s2778_s19 + $0x8] sm:$0xff] %vm1867_vm8, %v1865_v12 }

</bundles_post_ra>
